<compile_context>
chip_gen: v7x
topology: tpu7x:2x2x1
jax: 0.10.0
libtpu: 0.0.40
codegen_flags: <defaults>
</compile_context>

<pallas_src>
import functools

import jax
import jax.numpy as jnp
from jax.experimental import pallas as pl
from jax.experimental.pallas import tpu as pltpu

# ----------------------------- model sizes ---------------------------------
B = 2             # batch
L = 8             # tokens per segment (x1 and x2 have equal length here)
NUM_SEG = 2       # sent_ids=None path -> x1 / x2 are the two sentence segments
D = 128           # encoder output dim (synthetic; roberta-base would be 768)
HID = 128         # hidden_dim kw (transformer hidden & MLP hidden)
NUM_HEADS = 8     # num_perspectives
NUM_LABELS = 3
VOCAB = 64

_BN_SCALE = float(1.0 / (1.0 + 1e-5) ** 0.5)   # BatchNorm1d eval, default stats


# ---------------------------------------------------------------------------
# Fused HAN forward kernel (single launch, everything in VMEM).
# ---------------------------------------------------------------------------
def han_kernel(x1_ref, x2_ref, emb_ref,
               word_w_ref, word_v_ref,
               ln_g_ref, ln_b_ref,
               wqkv_ref, bqkv_ref, wo_ref, bo_ref,
               sent_w_ref, sent_v_ref,
               fc_w1_ref, fc_b1_ref, fc_w2_ref, fc_b2_ref,
               out_ref, *, num_heads):
    emb = emb_ref[...]                                     # (V, D)
    vocab, d = emb.shape

    # fold (linear, attn-vec) into a single matvec weight; the bias term is
    # constant over the softmax axis and cancels exactly.
    wv_word = jnp.dot(word_v_ref[...], word_w_ref[...],
                      preferred_element_type=jnp.float32)  # (1, D)
    wv_sent = jnp.dot(sent_v_ref[...], sent_w_ref[...],
                      preferred_element_type=jnp.float32)  # (1, D)

    # ---- word stage: encoder stand-in + word attention pooling, per segment
    seg_feats = []
    for tok_ref in (x1_ref, x2_ref):
        toks = tok_ref[...]                                # (B, L) int32
        bsz, seqlen = toks.shape
        # embedding lookup as one-hot matmul, entirely on-chip
        vid = jax.lax.broadcasted_iota(jnp.int32, (bsz, seqlen, vocab), 2)
        onehot = (toks[:, :, None] == vid).astype(jnp.float32)       # (B,L,V)
        wfeat = jnp.dot(onehot.reshape(bsz * seqlen, vocab), emb,
                        preferred_element_type=jnp.float32
                        ).reshape(bsz, seqlen, d)                    # (B,L,D)
        # attention pooling: score = feat @ (v @ W); softmax over L
        score = jnp.sum(wfeat * wv_word[None], axis=-1)              # (B, L)
        m = jnp.max(score, axis=1, keepdims=True)
        e = jnp.exp(score - m)
        w = e * pl.reciprocal(jnp.sum(e, axis=1, keepdims=True), approx=True)
        seg_feats.append(jnp.sum(wfeat * w[..., None], axis=1))      # (B, D)

    x = jnp.stack(seg_feats, axis=1)                       # (B, S, D)
    b, s, _ = x.shape
    h_dim = wqkv_ref.shape[1] // 3
    head_dim = h_dim // num_heads

    # ---- sentence TransformerLayer: pre-LN MHA + residual -------------------
    mu = jnp.mean(x, axis=-1, keepdims=True)
    var = jnp.mean(jnp.square(x - mu), axis=-1, keepdims=True)
    xn = (x - mu) * jax.lax.rsqrt(var + 1e-5)
    xn = xn * ln_g_ref[...][None] + ln_b_ref[...][None]

    xn2 = xn.reshape(b * s, d)
    qkv = (jnp.dot(xn2, wqkv_ref[...], preferred_element_type=jnp.float32)
           + bqkv_ref[...])                                # (B*S, 3H) fused QKV
    q = qkv[:, :h_dim].reshape(b, s, h_dim)
    k = qkv[:, h_dim:2 * h_dim].reshape(b, s, h_dim)
    v = qkv[:, 2 * h_dim:].reshape(b, s, h_dim)

    # all heads in one shot: head lane-block masks, heads folded into batch
    col = jax.lax.broadcasted_iota(jnp.int32, (num_heads, 1, 1, h_dim), 3)
    hidx = jax.lax.broadcasted_iota(jnp.int32, (num_heads, 1, 1, h_dim), 0)
    hmask = ((col >= hidx * head_dim)
             & (col < (hidx + 1) * head_dim)).astype(jnp.float32)   # (nh,1,1,H)

    qh = (q[None] * hmask).reshape(num_heads * b, s, h_dim)
    vh = (v[None] * hmask).reshape(num_heads * b, s, h_dim)
    kb = jnp.broadcast_to(k[None], (num_heads, b, s, h_dim)
                          ).reshape(num_heads * b, s, h_dim)

    scale = 1.0 / (float(head_dim) ** 0.5)
    sc = jnp.einsum('xid,xjd->xij', qh, kb,
                    preferred_element_type=jnp.float32) * scale     # (nh*B,S,S)
    m2 = jnp.max(sc, axis=-1, keepdims=True)
    e2 = jnp.exp(sc - m2)
    p = e2 * pl.reciprocal(jnp.sum(e2, axis=-1, keepdims=True), approx=True)
    ctx = jnp.einsum('xij,xjd->xid', p, vh,
                     preferred_element_type=jnp.float32)            # (nh*B,S,H)
    ctx = jnp.sum(ctx.reshape(num_heads, b, s, h_dim), axis=0)      # (B, S, H)

    attn_out = (jnp.dot(ctx.reshape(b * s, h_dim), wo_ref[...],
                        preferred_element_type=jnp.float32)
                + bo_ref[...]).reshape(b, s, d)
    y = x + attn_out                                                # residual

    # ---- sentence attention pooling (collapsed matvec; bias cancels) --------
    ssc = jnp.sum(y * wv_sent[None], axis=-1)                       # (B, S)
    sm = jnp.max(ssc, axis=1, keepdims=True)
    se = jnp.exp(ssc - sm)
    sw = se * pl.reciprocal(jnp.sum(se, axis=1, keepdims=True), approx=True)
    pooled = jnp.sum(y * sw[..., None], axis=1)                     # (B, D)

    # ---- MLP classifier: Linear -> BatchNorm(eval, default stats) -> Linear -
    hmid = (jnp.dot(pooled, fc_w1_ref[...], preferred_element_type=jnp.float32)
            + fc_b1_ref[...])
    hmid = hmid * _BN_SCALE
    out_ref[...] = (jnp.dot(hmid, fc_w2_ref[...],
                            preferred_element_type=jnp.float32)
                    + fc_b2_ref[...])                     # (B, NUM_LABELS)


# ---------------------------------------------------------------------------
# HAN forward: single Pallas launch (dropout p=0.0 -> identity).
# ---------------------------------------------------------------------------
def han_forward(params, x1, x2):
    bsz = x1.shape[0]
    kern = functools.partial(han_kernel, num_heads=NUM_HEADS)
    # No grid / no BlockSpecs: every (small) operand is mapped whole into VMEM.
    return pl.pallas_call(
        kern,
        out_shape=jax.ShapeDtypeStruct((bsz, NUM_LABELS), jnp.float32),
    )(x1, x2, params['emb'],
      params['word_w'], params['word_v'],
      params['ln_g'], params['ln_b'],
      params['wqkv'], params['bqkv'], params['wo'], params['bo'],
      params['sent_w'], params['sent_v'],
      params['fc_w1'], params['fc_b1'], params['fc_w2'], params['fc_b2'])


# ---------------------------------------------------------------------------
def init_params(key):
    def uni(k, shape, scale=0.1):
        return jax.random.uniform(k, shape, jnp.float32, -scale, scale)

    ks = jax.random.split(key, 20)
    return {
        'emb':    uni(ks[0], (VOCAB, D), 1.0),
        'word_w': uni(ks[1], (D, D)),
        'word_v': uni(ks[2], (1, D)),
        'ln_g':   jnp.ones((1, D), jnp.float32),
        'ln_b':   jnp.zeros((1, D), jnp.float32),
        # fused QKV projection (Wq|Wk|Wv) for the sentence transformer
        'wqkv':   uni(ks[3], (D, 3 * HID)),
        'bqkv':   uni(ks[4], (1, 3 * HID)),
        'wo':     uni(ks[5], (HID, D)),
        'bo':     uni(ks[6], (1, D)),
        'sent_w': uni(ks[7], (D, D)),
        'sent_v': uni(ks[8], (1, D)),
        'fc_w1':  uni(ks[9], (D, HID)),
        'fc_b1':  uni(ks[10], (1, HID)),
        'fc_w2':  uni(ks[12], (HID, NUM_LABELS)),
        'fc_b2':  uni(ks[13], (1, NUM_LABELS)),
    }


if __name__ == "__main__":
    key = jax.random.PRNGKey(0)
    kp, k1, k2 = jax.random.split(key, 3)
    params = init_params(kp)
    x1 = jax.random.randint(k1, (B, L), 0, VOCAB, dtype=jnp.int32)
    x2 = jax.random.randint(k2, (B, L), 0, VOCAB, dtype=jnp.int32)

    out = jax.jit(han_forward)(params, x1, x2)
    out = jax.block_until_ready(out)
    assert out.shape == (B, NUM_LABELS) and out.dtype == jnp.float32
    print("KERNEL_OK")
</pallas_src>

<mosaic_0001>
module attributes {stable_mosaic.version = 11 : i64} {
  func.func @han_kernel(%arg0: memref<2x8xi32, #tpu.memory_space<vmem>>, %arg1: memref<2x8xi32, #tpu.memory_space<vmem>>, %arg2: memref<64x128xf32, #tpu.memory_space<vmem>>, %arg3: memref<128x128xf32, #tpu.memory_space<vmem>>, %arg4: memref<1x128xf32, #tpu.memory_space<vmem>>, %arg5: memref<1x128xf32, #tpu.memory_space<vmem>>, %arg6: memref<1x128xf32, #tpu.memory_space<vmem>>, %arg7: memref<128x384xf32, #tpu.memory_space<vmem>>, %arg8: memref<1x384xf32, #tpu.memory_space<vmem>>, %arg9: memref<128x128xf32, #tpu.memory_space<vmem>>, %arg10: memref<1x128xf32, #tpu.memory_space<vmem>>, %arg11: memref<128x128xf32, #tpu.memory_space<vmem>>, %arg12: memref<1x128xf32, #tpu.memory_space<vmem>>, %arg13: memref<128x128xf32, #tpu.memory_space<vmem>>, %arg14: memref<1x128xf32, #tpu.memory_space<vmem>>, %arg15: memref<128x3xf32, #tpu.memory_space<vmem>>, %arg16: memref<1x3xf32, #tpu.memory_space<vmem>>, %arg17: memref<2x3xf32, #tpu.memory_space<vmem>>) attributes {dimension_semantics = [], scalar_prefetch = 0 : i64, scratch_operands = 0 : i64, tpu.core_type = #tpu.core_type<tc>} {
    %c0 = arith.constant 0 : index
    %c0_0 = arith.constant 0 : index
    %0 = vector.load %arg2[%c0, %c0_0] : memref<64x128xf32, #tpu.memory_space<vmem>>, vector<64x128xf32>
    %c0_1 = arith.constant 0 : index
    %c0_2 = arith.constant 0 : index
    %1 = vector.load %arg4[%c0_1, %c0_2] : memref<1x128xf32, #tpu.memory_space<vmem>>, vector<1x128xf32>
    %c0_3 = arith.constant 0 : index
    %c0_4 = arith.constant 0 : index
    %2 = vector.load %arg3[%c0_3, %c0_4] : memref<128x128xf32, #tpu.memory_space<vmem>>, vector<128x128xf32>
    %cst = arith.constant dense<0.000000e+00> : vector<1x128xf32>
    %3 = tpu.matmul %1, %2, %cst {dimension_numbers = #tpu.dot_dimension_numbers<[1], [0], [0], [1], [0, 0, 1, 1], [], []>} : vector<1x128xf32>, vector<128x128xf32>, vector<1x128xf32> -> vector<1x128xf32>
    %c0_5 = arith.constant 0 : index
    %c0_6 = arith.constant 0 : index
    %4 = vector.load %arg12[%c0_5, %c0_6] : memref<1x128xf32, #tpu.memory_space<vmem>>, vector<1x128xf32>
    %c0_7 = arith.constant 0 : index
    %c0_8 = arith.constant 0 : index
    %5 = vector.load %arg11[%c0_7, %c0_8] : memref<128x128xf32, #tpu.memory_space<vmem>>, vector<128x128xf32>
    %cst_9 = arith.constant dense<0.000000e+00> : vector<1x128xf32>
    %6 = tpu.matmul %4, %5, %cst_9 {dimension_numbers = #tpu.dot_dimension_numbers<[1], [0], [0], [1], [0, 0, 1, 1], [], []>} : vector<1x128xf32>, vector<128x128xf32>, vector<1x128xf32> -> vector<1x128xf32>
    %c0_10 = arith.constant 0 : index
    %c0_11 = arith.constant 0 : index
    %7 = vector.load %arg0[%c0_10, %c0_11] : memref<2x8xi32, #tpu.memory_space<vmem>>, vector<2x8xi32>
    %8 = tpu.iota {dimensions = array<i32: 2>} : vector<2x8x64xi32>
    %9 = vector.shape_cast %7 : vector<2x8xi32> to vector<2x8x1xi32>
    %10 = vector.broadcast %9 : vector<2x8x1xi32> to vector<2x8x64xi32>
    %11 = arith.cmpi eq, %10, %8 : vector<2x8x64xi32>
    %12 = arith.extui %11 : vector<2x8x64xi1> to vector<2x8x64xi32>
    %13 = arith.sitofp %12 : vector<2x8x64xi32> to vector<2x8x64xf32>
    %14 = vector.shape_cast %13 : vector<2x8x64xf32> to vector<16x64xf32>
    %cst_12 = arith.constant dense<0.000000e+00> : vector<16x128xf32>
    %15 = tpu.matmul %14, %0, %cst_12 {dimension_numbers = #tpu.dot_dimension_numbers<[1], [0], [0], [1], [0, 0, 1, 1], [], []>} : vector<16x64xf32>, vector<64x128xf32>, vector<16x128xf32> -> vector<16x128xf32>
    %16 = vector.shape_cast %15 : vector<16x128xf32> to vector<2x8x128xf32>
    %17 = vector.shape_cast %3 : vector<1x128xf32> to vector<1x1x128xf32>
    %18 = vector.broadcast %17 : vector<1x1x128xf32> to vector<2x8x128xf32>
    %19 = arith.mulf %16, %18 : vector<2x8x128xf32>
    %cst_13 = arith.constant dense<0.000000e+00> : vector<2x8xf32>
    %20 = vector.multi_reduction <add>, %19, %cst_13 [2] : vector<2x8x128xf32> to vector<2x8xf32>
    %cst_14 = arith.constant dense<0xFF800000> : vector<2xf32>
    %21 = vector.multi_reduction <maximumf>, %20, %cst_14 [1] : vector<2x8xf32> to vector<2xf32>
    %22 = vector.shape_cast %21 : vector<2xf32> to vector<2x1xf32>
    %23 = vector.broadcast %22 : vector<2x1xf32> to vector<2x8xf32>
    %24 = arith.subf %20, %23 : vector<2x8xf32>
    %25 = math.exp %24 : vector<2x8xf32>
    %cst_15 = arith.constant dense<0.000000e+00> : vector<2xf32>
    %26 = vector.multi_reduction <add>, %25, %cst_15 [1] : vector<2x8xf32> to vector<2xf32>
    %27 = vector.shape_cast %26 : vector<2xf32> to vector<2x1xf32>
    %28 = tpu.reciprocal %27 {approx = true} : vector<2x1xf32> -> vector<2x1xf32>
    %29 = vector.broadcast %28 : vector<2x1xf32> to vector<2x8xf32>
    %30 = arith.mulf %25, %29 : vector<2x8xf32>
    %31 = vector.shape_cast %30 : vector<2x8xf32> to vector<2x8x1xf32>
    %32 = vector.broadcast %31 : vector<2x8x1xf32> to vector<2x8x128xf32>
    %33 = arith.mulf %16, %32 : vector<2x8x128xf32>
    %cst_16 = arith.constant dense<0.000000e+00> : vector<2x128xf32>
    %34 = vector.multi_reduction <add>, %33, %cst_16 [1] : vector<2x8x128xf32> to vector<2x128xf32>
    %c0_17 = arith.constant 0 : index
    %c0_18 = arith.constant 0 : index
    %35 = vector.load %arg1[%c0_17, %c0_18] : memref<2x8xi32, #tpu.memory_space<vmem>>, vector<2x8xi32>
    %36 = tpu.iota {dimensions = array<i32: 2>} : vector<2x8x64xi32>
    %37 = vector.shape_cast %35 : vector<2x8xi32> to vector<2x8x1xi32>
    %38 = vector.broadcast %37 : vector<2x8x1xi32> to vector<2x8x64xi32>
    %39 = arith.cmpi eq, %38, %36 : vector<2x8x64xi32>
    %40 = arith.extui %39 : vector<2x8x64xi1> to vector<2x8x64xi32>
    %41 = arith.sitofp %40 : vector<2x8x64xi32> to vector<2x8x64xf32>
    %42 = vector.shape_cast %41 : vector<2x8x64xf32> to vector<16x64xf32>
    %cst_19 = arith.constant dense<0.000000e+00> : vector<16x128xf32>
    %43 = tpu.matmul %42, %0, %cst_19 {dimension_numbers = #tpu.dot_dimension_numbers<[1], [0], [0], [1], [0, 0, 1, 1], [], []>} : vector<16x64xf32>, vector<64x128xf32>, vector<16x128xf32> -> vector<16x128xf32>
    %44 = vector.shape_cast %43 : vector<16x128xf32> to vector<2x8x128xf32>
    %45 = vector.shape_cast %3 : vector<1x128xf32> to vector<1x1x128xf32>
    %46 = vector.broadcast %45 : vector<1x1x128xf32> to vector<2x8x128xf32>
    %47 = arith.mulf %44, %46 : vector<2x8x128xf32>
    %cst_20 = arith.constant dense<0.000000e+00> : vector<2x8xf32>
    %48 = vector.multi_reduction <add>, %47, %cst_20 [2] : vector<2x8x128xf32> to vector<2x8xf32>
    %cst_21 = arith.constant dense<0xFF800000> : vector<2xf32>
    %49 = vector.multi_reduction <maximumf>, %48, %cst_21 [1] : vector<2x8xf32> to vector<2xf32>
    %50 = vector.shape_cast %49 : vector<2xf32> to vector<2x1xf32>
    %51 = vector.broadcast %50 : vector<2x1xf32> to vector<2x8xf32>
    %52 = arith.subf %48, %51 : vector<2x8xf32>
    %53 = math.exp %52 : vector<2x8xf32>
    %cst_22 = arith.constant dense<0.000000e+00> : vector<2xf32>
    %54 = vector.multi_reduction <add>, %53, %cst_22 [1] : vector<2x8xf32> to vector<2xf32>
    %55 = vector.shape_cast %54 : vector<2xf32> to vector<2x1xf32>
    %56 = tpu.reciprocal %55 {approx = true} : vector<2x1xf32> -> vector<2x1xf32>
    %57 = vector.broadcast %56 : vector<2x1xf32> to vector<2x8xf32>
    %58 = arith.mulf %53, %57 : vector<2x8xf32>
    %59 = vector.shape_cast %58 : vector<2x8xf32> to vector<2x8x1xf32>
    %60 = vector.broadcast %59 : vector<2x8x1xf32> to vector<2x8x128xf32>
    %61 = arith.mulf %44, %60 : vector<2x8x128xf32>
    %cst_23 = arith.constant dense<0.000000e+00> : vector<2x128xf32>
    %62 = vector.multi_reduction <add>, %61, %cst_23 [1] : vector<2x8x128xf32> to vector<2x128xf32>
    %63 = vector.shape_cast %34 : vector<2x128xf32> to vector<2x1x128xf32>
    %64 = vector.shape_cast %62 : vector<2x128xf32> to vector<2x1x128xf32>
    %65 = tpu.concatenate %63, %64 in 1 : vector<2x1x128xf32>, vector<2x1x128xf32> -> vector<2x2x128xf32>
    %cst_24 = arith.constant dense<0.000000e+00> : vector<2x2xf32>
    %66 = vector.multi_reduction <add>, %65, %cst_24 [2] : vector<2x2x128xf32> to vector<2x2xf32>
    %67 = vector.shape_cast %66 : vector<2x2xf32> to vector<2x2x1xf32>
    %cst_25 = arith.constant 1.280000e+02 : f32
    %68 = vector.broadcast %cst_25 : f32 to vector<2x2x1xf32>
    %69 = arith.divf %67, %68 : vector<2x2x1xf32>
    %70 = vector.broadcast %69 : vector<2x2x1xf32> to vector<2x2x128xf32>
    %71 = arith.subf %65, %70 : vector<2x2x128xf32>
    %72 = arith.mulf %71, %71 : vector<2x2x128xf32>
    %cst_26 = arith.constant dense<0.000000e+00> : vector<2x2xf32>
    %73 = vector.multi_reduction <add>, %72, %cst_26 [2] : vector<2x2x128xf32> to vector<2x2xf32>
    %74 = vector.shape_cast %73 : vector<2x2xf32> to vector<2x2x1xf32>
    %cst_27 = arith.constant 1.280000e+02 : f32
    %75 = vector.broadcast %cst_27 : f32 to vector<2x2x1xf32>
    %76 = arith.divf %74, %75 : vector<2x2x1xf32>
    %77 = vector.broadcast %69 : vector<2x2x1xf32> to vector<2x2x128xf32>
    %78 = arith.subf %65, %77 : vector<2x2x128xf32>
    %cst_28 = arith.constant 9.99999974E-6 : f32
    %79 = vector.broadcast %cst_28 : f32 to vector<2x2x1xf32>
    %80 = arith.addf %76, %79 : vector<2x2x1xf32>
    %81 = math.rsqrt %80 : vector<2x2x1xf32>
    %82 = vector.broadcast %81 : vector<2x2x1xf32> to vector<2x2x128xf32>
    %83 = arith.mulf %78, %82 : vector<2x2x128xf32>
    %c0_29 = arith.constant 0 : index
    %c0_30 = arith.constant 0 : index
    %84 = vector.load %arg5[%c0_29, %c0_30] : memref<1x128xf32, #tpu.memory_space<vmem>>, vector<1x128xf32>
    %85 = vector.shape_cast %84 : vector<1x128xf32> to vector<1x1x128xf32>
    %86 = vector.broadcast %85 : vector<1x1x128xf32> to vector<2x2x128xf32>
    %87 = arith.mulf %83, %86 : vector<2x2x128xf32>
    %c0_31 = arith.constant 0 : index
    %c0_32 = arith.constant 0 : index
    %88 = vector.load %arg6[%c0_31, %c0_32] : memref<1x128xf32, #tpu.memory_space<vmem>>, vector<1x128xf32>
    %89 = vector.shape_cast %88 : vector<1x128xf32> to vector<1x1x128xf32>
    %90 = vector.broadcast %89 : vector<1x1x128xf32> to vector<2x2x128xf32>
    %91 = arith.addf %87, %90 : vector<2x2x128xf32>
    %92 = vector.shape_cast %91 : vector<2x2x128xf32> to vector<4x128xf32>
    %c0_33 = arith.constant 0 : index
    %c0_34 = arith.constant 0 : index
    %93 = vector.load %arg7[%c0_33, %c0_34] : memref<128x384xf32, #tpu.memory_space<vmem>>, vector<128x384xf32>
    %cst_35 = arith.constant dense<0.000000e+00> : vector<4x384xf32>
    %94 = tpu.matmul %92, %93, %cst_35 {dimension_numbers = #tpu.dot_dimension_numbers<[1], [0], [0], [1], [0, 0, 1, 1], [], []>} : vector<4x128xf32>, vector<128x384xf32>, vector<4x384xf32> -> vector<4x384xf32>
    %c0_36 = arith.constant 0 : index
    %c0_37 = arith.constant 0 : index
    %95 = vector.load %arg8[%c0_36, %c0_37] : memref<1x384xf32, #tpu.memory_space<vmem>>, vector<1x384xf32>
    %96 = vector.broadcast %95 : vector<1x384xf32> to vector<4x384xf32>
    %97 = arith.addf %94, %96 : vector<4x384xf32>
    %98 = vector.extract_strided_slice %97 {offsets = [0, 0], sizes = [4, 128], strides = [1, 1]} : vector<4x384xf32> to vector<4x128xf32>
    %99 = vector.shape_cast %98 : vector<4x128xf32> to vector<2x2x128xf32>
    %100 = vector.extract_strided_slice %97 {offsets = [0, 128], sizes = [4, 128], strides = [1, 1]} : vector<4x384xf32> to vector<4x128xf32>
    %101 = vector.shape_cast %100 : vector<4x128xf32> to vector<2x2x128xf32>
    %102 = vector.extract_strided_slice %97 {offsets = [0, 256], sizes = [4, 128], strides = [1, 1]} : vector<4x384xf32> to vector<4x128xf32>
    %103 = vector.shape_cast %102 : vector<4x128xf32> to vector<2x2x128xf32>
    %104 = tpu.iota {dimensions = array<i32: 3>} : vector<8x1x1x128xi32>
    %105 = tpu.iota {dimensions = array<i32: 0>} : vector<8x1x1x128xi32>
    %c16_i32 = arith.constant 16 : i32
    %106 = vector.broadcast %c16_i32 : i32 to vector<8x1x1x128xi32>
    %107 = arith.muli %105, %106 : vector<8x1x1x128xi32>
    %108 = arith.cmpi sge, %104, %107 : vector<8x1x1x128xi32>
    %c1_i32 = arith.constant 1 : i32
    %109 = vector.broadcast %c1_i32 : i32 to vector<8x1x1x128xi32>
    %110 = arith.addi %105, %109 : vector<8x1x1x128xi32>
    %c16_i32_38 = arith.constant 16 : i32
    %111 = vector.broadcast %c16_i32_38 : i32 to vector<8x1x1x128xi32>
    %112 = arith.muli %110, %111 : vector<8x1x1x128xi32>
    %113 = arith.cmpi slt, %104, %112 : vector<8x1x1x128xi32>
    %114 = arith.andi %108, %113 : vector<8x1x1x128xi1>
    %115 = arith.extui %114 : vector<8x1x1x128xi1> to vector<8x1x1x128xi32>
    %116 = arith.sitofp %115 : vector<8x1x1x128xi32> to vector<8x1x1x128xf32>
    %117 = vector.shape_cast %99 : vector<2x2x128xf32> to vector<1x2x2x128xf32>
    %118 = vector.broadcast %117 : vector<1x2x2x128xf32> to vector<8x2x2x128xf32>
    %119 = vector.broadcast %116 : vector<8x1x1x128xf32> to vector<8x2x2x128xf32>
    %120 = arith.mulf %118, %119 : vector<8x2x2x128xf32>
    %121 = vector.shape_cast %120 : vector<8x2x2x128xf32> to vector<16x2x128xf32>
    %122 = vector.shape_cast %103 : vector<2x2x128xf32> to vector<1x2x2x128xf32>
    %123 = vector.broadcast %122 : vector<1x2x2x128xf32> to vector<8x2x2x128xf32>
    %124 = vector.broadcast %116 : vector<8x1x1x128xf32> to vector<8x2x2x128xf32>
    %125 = arith.mulf %123, %124 : vector<8x2x2x128xf32>
    %126 = vector.shape_cast %125 : vector<8x2x2x128xf32> to vector<16x2x128xf32>
    %127 = vector.shape_cast %101 : vector<2x2x128xf32> to vector<1x2x2x128xf32>
    %128 = vector.shape_cast %127 : vector<1x2x2x128xf32> to vector<1x2x2x128xf32>
    %129 = vector.broadcast %128 : vector<1x2x2x128xf32> to vector<8x2x2x128xf32>
    %130 = vector.shape_cast %129 : vector<8x2x2x128xf32> to vector<16x2x128xf32>
    "tpu.trace_start"() <{level = 10 : i32, message = "xid,xjd->xij"}> : () -> ()
    %cst_39 = arith.constant dense<0.000000e+00> : vector<16x2x2xf32>
    %131 = tpu.matmul %121, %130, %cst_39 {dimension_numbers = #tpu.dot_dimension_numbers<[2], [2], [1], [1], [0, 0, 0, 1, 1, 1], [0], [0]>} : vector<16x2x128xf32>, vector<16x2x128xf32>, vector<16x2x2xf32> -> vector<16x2x2xf32>
    "tpu.trace_stop"() : () -> ()
    %cst_40 = arith.constant 2.500000e-01 : f32
    %132 = vector.broadcast %cst_40 : f32 to vector<16x2x2xf32>
    %133 = arith.mulf %131, %132 : vector<16x2x2xf32>
    %cst_41 = arith.constant dense<0xFF800000> : vector<16x2xf32>
    %134 = vector.multi_reduction <maximumf>, %133, %cst_41 [2] : vector<16x2x2xf32> to vector<16x2xf32>
    %135 = vector.shape_cast %134 : vector<16x2xf32> to vector<16x2x1xf32>
    %136 = vector.broadcast %135 : vector<16x2x1xf32> to vector<16x2x2xf32>
    %137 = arith.subf %133, %136 : vector<16x2x2xf32>
    %138 = math.exp %137 : vector<16x2x2xf32>
    %cst_42 = arith.constant dense<0.000000e+00> : vector<16x2xf32>
    %139 = vector.multi_reduction <add>, %138, %cst_42 [2] : vector<16x2x2xf32> to vector<16x2xf32>
    %140 = vector.shape_cast %139 : vector<16x2xf32> to vector<16x2x1xf32>
    %141 = tpu.reciprocal %140 {approx = true} : vector<16x2x1xf32> -> vector<16x2x1xf32>
    %142 = vector.broadcast %141 : vector<16x2x1xf32> to vector<16x2x2xf32>
    %143 = arith.mulf %138, %142 : vector<16x2x2xf32>
    "tpu.trace_start"() <{level = 10 : i32, message = "xij,xjd->xid"}> : () -> ()
    %cst_43 = arith.constant dense<0.000000e+00> : vector<16x2x128xf32>
    %144 = tpu.matmul %143, %126, %cst_43 {dimension_numbers = #tpu.dot_dimension_numbers<[2], [1], [1], [2], [0, 0, 0, 1, 1, 2], [0], [0]>} : vector<16x2x2xf32>, vector<16x2x128xf32>, vector<16x2x128xf32> -> vector<16x2x128xf32>
    "tpu.trace_stop"() : () -> ()
    %145 = vector.shape_cast %144 : vector<16x2x128xf32> to vector<8x2x2x128xf32>
    %cst_44 = arith.constant dense<0.000000e+00> : vector<2x2x128xf32>
    %146 = vector.multi_reduction <add>, %145, %cst_44 [0] : vector<8x2x2x128xf32> to vector<2x2x128xf32>
    %147 = vector.shape_cast %146 : vector<2x2x128xf32> to vector<4x128xf32>
    %c0_45 = arith.constant 0 : index
    %c0_46 = arith.constant 0 : index
    %148 = vector.load %arg9[%c0_45, %c0_46] : memref<128x128xf32, #tpu.memory_space<vmem>>, vector<128x128xf32>
    %cst_47 = arith.constant dense<0.000000e+00> : vector<4x128xf32>
    %149 = tpu.matmul %147, %148, %cst_47 {dimension_numbers = #tpu.dot_dimension_numbers<[1], [0], [0], [1], [0, 0, 1, 1], [], []>} : vector<4x128xf32>, vector<128x128xf32>, vector<4x128xf32> -> vector<4x128xf32>
    %c0_48 = arith.constant 0 : index
    %c0_49 = arith.constant 0 : index
    %150 = vector.load %arg10[%c0_48, %c0_49] : memref<1x128xf32, #tpu.memory_space<vmem>>, vector<1x128xf32>
    %151 = vector.broadcast %150 : vector<1x128xf32> to vector<4x128xf32>
    %152 = arith.addf %149, %151 : vector<4x128xf32>
    %153 = vector.shape_cast %152 : vector<4x128xf32> to vector<2x2x128xf32>
    %154 = arith.addf %65, %153 : vector<2x2x128xf32>
    %155 = vector.shape_cast %6 : vector<1x128xf32> to vector<1x1x128xf32>
    %156 = vector.broadcast %155 : vector<1x1x128xf32> to vector<2x2x128xf32>
    %157 = arith.mulf %154, %156 : vector<2x2x128xf32>
    %cst_50 = arith.constant dense<0.000000e+00> : vector<2x2xf32>
    %158 = vector.multi_reduction <add>, %157, %cst_50 [2] : vector<2x2x128xf32> to vector<2x2xf32>
    %cst_51 = arith.constant dense<0xFF800000> : vector<2xf32>
    %159 = vector.multi_reduction <maximumf>, %158, %cst_51 [1] : vector<2x2xf32> to vector<2xf32>
    %160 = vector.shape_cast %159 : vector<2xf32> to vector<2x1xf32>
    %161 = vector.broadcast %160 : vector<2x1xf32> to vector<2x2xf32>
    %162 = arith.subf %158, %161 : vector<2x2xf32>
    %163 = math.exp %162 : vector<2x2xf32>
    %cst_52 = arith.constant dense<0.000000e+00> : vector<2xf32>
    %164 = vector.multi_reduction <add>, %163, %cst_52 [1] : vector<2x2xf32> to vector<2xf32>
    %165 = vector.shape_cast %164 : vector<2xf32> to vector<2x1xf32>
    %166 = tpu.reciprocal %165 {approx = true} : vector<2x1xf32> -> vector<2x1xf32>
    %167 = vector.broadcast %166 : vector<2x1xf32> to vector<2x2xf32>
    %168 = arith.mulf %163, %167 : vector<2x2xf32>
    %169 = vector.shape_cast %168 : vector<2x2xf32> to vector<2x2x1xf32>
    %170 = vector.broadcast %169 : vector<2x2x1xf32> to vector<2x2x128xf32>
    %171 = arith.mulf %154, %170 : vector<2x2x128xf32>
    %cst_53 = arith.constant dense<0.000000e+00> : vector<2x128xf32>
    %172 = vector.multi_reduction <add>, %171, %cst_53 [1] : vector<2x2x128xf32> to vector<2x128xf32>
    %c0_54 = arith.constant 0 : index
    %c0_55 = arith.constant 0 : index
    %173 = vector.load %arg13[%c0_54, %c0_55] : memref<128x128xf32, #tpu.memory_space<vmem>>, vector<128x128xf32>
    %cst_56 = arith.constant dense<0.000000e+00> : vector<2x128xf32>
    %174 = tpu.matmul %172, %173, %cst_56 {dimension_numbers = #tpu.dot_dimension_numbers<[1], [0], [0], [1], [0, 0, 1, 1], [], []>} : vector<2x128xf32>, vector<128x128xf32>, vector<2x128xf32> -> vector<2x128xf32>
    %c0_57 = arith.constant 0 : index
    %c0_58 = arith.constant 0 : index
    %175 = vector.load %arg14[%c0_57, %c0_58] : memref<1x128xf32, #tpu.memory_space<vmem>>, vector<1x128xf32>
    %176 = vector.broadcast %175 : vector<1x128xf32> to vector<2x128xf32>
    %177 = arith.addf %174, %176 : vector<2x128xf32>
    %cst_59 = arith.constant 0.999994993 : f32
    %178 = vector.broadcast %cst_59 : f32 to vector<2x128xf32>
    %179 = arith.mulf %177, %178 : vector<2x128xf32>
    %c0_60 = arith.constant 0 : index
    %c0_61 = arith.constant 0 : index
    %180 = vector.load %arg15[%c0_60, %c0_61] : memref<128x3xf32, #tpu.memory_space<vmem>>, vector<128x3xf32>
    %cst_62 = arith.constant dense<0.000000e+00> : vector<2x3xf32>
    %181 = tpu.matmul %179, %180, %cst_62 {dimension_numbers = #tpu.dot_dimension_numbers<[1], [0], [0], [1], [0, 0, 1, 1], [], []>} : vector<2x128xf32>, vector<128x3xf32>, vector<2x3xf32> -> vector<2x3xf32>
    %c0_63 = arith.constant 0 : index
    %c0_64 = arith.constant 0 : index
    %182 = vector.load %arg16[%c0_63, %c0_64] : memref<1x3xf32, #tpu.memory_space<vmem>>, vector<1x3xf32>
    %183 = vector.broadcast %182 : vector<1x3xf32> to vector<2x3xf32>
    %184 = arith.addf %181, %183 : vector<2x3xf32>
    %c0_65 = arith.constant 0 : index
    %c0_66 = arith.constant 0 : index
    %185 = vector.load %arg17[%c0_65, %c0_66] : memref<2x3xf32, #tpu.memory_space<vmem>>, vector<2x3xf32>
    tpu.vector_store %arg17[%c0_65, %c0_66], %184 {strides = array<i32>} : memref<2x3xf32, #tpu.memory_space<vmem>>, vector<2x3xf32>,
    return
  }
}

</mosaic_0001>

<bundles_post_ra>
// kernel: han_forward.1
= control target key start
LH: loop header
LB: loop body
LE: loop exit
PB: predicated region body
PF: predicated region fallthrough
CT: control target
= control target key end

     0   :  { %s6161_s0 = inlined_call_operand.vmem [shape: s32[2,8], index: 0, kind: input, shape index: {}]   ;;  %s6162_s1 = inlined_call_operand.vmem [shape: s32[2,8], index: 1, kind: input, shape index: {}]   ;;  %s6163_s2 = inlined_call_operand.hbm [shape: f32[64,128], index: 2, kind: input, shape index: {}]   ;;  %s6164_s3 = inlined_call_operand.vmem [shape: f32[128,128], index: 3, kind: input, shape index: {}]   ;;  %s6165_s4 = inlined_call_operand.vmem [shape: f32[1,128], index: 4, kind: input, shape index: {}]   ;;  %s6166_s5 = inlined_call_operand.vmem [shape: f32[1,128], index: 5, kind: input, shape index: {}]   ;;  %s6167_s6 = inlined_call_operand.vmem [shape: f32[1,128], index: 6, kind: input, shape index: {}]   ;;  %s6168_s7 = inlined_call_operand.hbm [shape: f32[128,384], index: 7, kind: input, shape index: {}]   ;;  %s6169_s8 = inlined_call_operand.vmem [shape: f32[1,384], index: 8, kind: input, shape index: {}]   ;;  %s6170_s9 = inlined_call_operand.hbm [shape: f32[128,128], index: 9, kind: input, shape index: {}]   ;;  %s6171_s10 = inlined_call_operand.vmem [shape: f32[1,128], index: 10, kind: input, shape index: {}]   ;;  %s6172_s11 = inlined_call_operand.hbm [shape: f32[128,128], index: 11, kind: input, shape index: {}]   ;;  %s6173_s12 = inlined_call_operand.vmem [shape: f32[1,128], index: 12, kind: input, shape index: {}]   ;;  %s6174_s13 = inlined_call_operand.hbm [shape: f32[128,128], index: 13, kind: input, shape index: {}]   ;;  %s6175_s14 = inlined_call_operand.vmem [shape: f32[1,128], index: 14, kind: input, shape index: {}]   ;;  %s6176_s15 = inlined_call_operand.vmem [shape: f32[128,3], index: 15, kind: input, shape index: {}]   ;;  %s6177_s16 = inlined_call_operand.vmem [shape: f32[1,3], index: 16, kind: input, shape index: {}]   ;;  %s6178_s17 = inlined_call_operand.hbm [shape: f32[2,3], index: 17, kind: output, shape index: {}]  }
   0x1   :  { %6180 = sst [smem:[#allocation16_spill]] %s6161_s0 }
   0x2   :  { %6181 = sst [smem:[#allocation17_spill]] %s6162_s1 }
   0x3   :  { %6182 = sst [smem:[#allocation18_spill]] %s6178_s17 }
   0x4   :  { %22 = vsyncpa [#allocation3], 0 }
   0x5   :  { %23 = vsyncpa [#allocation6], 0 }
   0x6   :  { %24 = vsyncpa [#allocation9], 0 }
   0x7   :  { %25 = vsyncpa [#allocation4], 0  ;;  %s5175_s24 = smov [#allocation5]   ;;  %s5035_s28 = scalar_lea.hbm %s6168_s7, 6144 }
   0x8   :  { %s55_s25 = sshll.u32 %s5175_s24, 4  ;;  %p5036_p0 = scmp.ne.s32.totalorder %s6168_s7, %s5035_s28  ;;  %s56_s25 = int_to_ptr.vmem [resolvable:$true] %s55_s25 }
   0x9   :  { %p5039_p1 = scmp.lt.u32.totalorder %s5035_s28, %s6168_s7 }
   0xb   :  { %p5041_p2 = pnand %p5039_p1, %p5036_p0 }
   0xd   :  { %5044 = shalt.err (!%p5041_p2)
}
   0xe   :  { %s5045_s19 = scalar_lea.vmem %s56_s25, 6144  ;;  %p5050_p4 = scmp.lt.s32.totalorder %s56_s25, %s56_s25 }
   0xf   :  { %p5046_p3 = scmp.ne.s32.totalorder %s56_s25, %s5045_s19  ;;  %p5051_p5 = scmp.lt.s32.totalorder %s5045_s19, %s5045_s19 }
  0x11   :  { %p5052_p6 = por %p5051_p5, %p5050_p4 }
  0x13   :  { %p5053_p7 = pnand %p5052_p6, %p5046_p3 }
  0x15   :  { %5056 = shalt.err (!%p5053_p7)
}
  0x16   :  { %s5176_s1 = smov 384   ;;  %s5177_s20 = smov 24  }
  0x17   :  { %61 = dma.hbm_to_vmem [thread:$0]  %s6168_s7, 6144, %s56_s25, [#allocation6], %s5176_s1, %s5176_s1, %s5177_s20  }
  0x18   :  { %s5178_s23 = smov [#allocation8]   ;;  %s5179_s26 = smov [#allocation2]  }
  0x19   :  { %s83_s24 = sshll.u32 %s5178_s23, 4  ;;  %s35_s27 = sshll.u32 %s5179_s26, 4  ;;  %s84_s24 = int_to_ptr.vmem [resolvable:$true] %s83_s24  ;;  %s36_s27 = int_to_ptr.vmem [resolvable:$true] %s35_s27 }
  0x1a   :  { %s5057_s0 = scalar_lea.hbm %s6172_s11, 2048 }
  0x1b   :  { %p5058_p8 = scmp.ne.s32.totalorder %s6172_s11, %s5057_s0  ;;  %p5061_p9 = scmp.lt.u32.totalorder %s5057_s0, %s6172_s11 }
  0x1d   :  { %p5063_p10 = pnand %p5061_p9, %p5058_p8 }
  0x1f   :  { %5066 = shalt.err (!%p5063_p10)
}
  0x20   :  { %s5067_s7 = scalar_lea.vmem %s84_s24, 2048  ;;  %p5072_p12 = scmp.lt.s32.totalorder %s84_s24, %s84_s24 }
  0x21   :  { %p5068_p11 = scmp.ne.s32.totalorder %s84_s24, %s5067_s7  ;;  %p5073_p13 = scmp.lt.s32.totalorder %s5067_s7, %s5067_s7 }
  0x23   :  { %p5074_p0 = por %p5073_p13, %p5072_p12 }
  0x25   :  { %p5075_p1 = pnand %p5074_p0, %p5068_p11 }
  0x27   :  { %5078 = shalt.err (!%p5075_p1)
}
  0x28   :  { %s5180_s25 = smov 128   ;;  %s5181_s1 = smov 8  }
  0x29   :  { %89 = dma.hbm_to_vmem [thread:$0]  %s6172_s11, 2048, %s84_s24, [#allocation9], %s5180_s25, %s5180_s25, %s5181_s1  }
  0x2a   :  { %s5079_s23 = scalar_lea.hbm %s6163_s2, 1024 }
  0x2b   :  { %p5080_p2 = scmp.ne.s32.totalorder %s6163_s2, %s5079_s23  ;;  %p5083_p3 = scmp.lt.u32.totalorder %s5079_s23, %s6163_s2 }
  0x2d   :  { %p5085_p4 = pnand %p5083_p3, %p5080_p2 }
  0x2f   :  { %5088 = shalt.err (!%p5085_p4)
}
  0x30   :  { %s5089_s30 = scalar_lea.vmem %s36_s27, 1024  ;;  %p5094_p6 = scmp.lt.s32.totalorder %s36_s27, %s36_s27 }
  0x31   :  { %p5090_p5 = scmp.ne.s32.totalorder %s36_s27, %s5089_s30  ;;  %p5095_p7 = scmp.lt.s32.totalorder %s5089_s30, %s5089_s30 }
  0x33   :  { %p5096_p8 = por %p5095_p7, %p5094_p6 }
  0x35   :  { %p5097_p9 = pnand %p5096_p8, %p5090_p5 }
  0x37   :  { %5100 = shalt.err (!%p5097_p9)
}
  0x38   :  { %41 = dma.hbm_to_vmem [thread:$0]  %s6163_s2, 1024, %s36_s27, [#allocation3], %s5180_s25, %s5180_s25, %s5181_s1  }
  0x39   :  { %s5182_s18 = smov [#allocation7]   ;;  %s5183_s7 = smov [#allocation10]  }
  0x3a   :  { %s69_s19 = sshll.u32 %s5182_s18, 4  ;;  %s97_s20 = sshll.u32 %s5183_s7, 4  ;;  %s70_s19 = int_to_ptr.vmem [resolvable:$true] %s69_s19  ;;  %s98_s20 = int_to_ptr.vmem [resolvable:$true] %s97_s20 }
  0x3b   :  { %s5101_s22 = scalar_lea.hbm %s6170_s9, 2048 }
  0x3c   :  { %p5102_p10 = scmp.ne.s32.totalorder %s6170_s9, %s5101_s22  ;;  %p5105_p11 = scmp.lt.u32.totalorder %s5101_s22, %s6170_s9 }
  0x3e   :  { %p5107_p12 = pnand %p5105_p11, %p5102_p10 }
  0x40   :  { %5110 = shalt.err (!%p5107_p12)
}
  0x41   :  { %s5111_s2 = scalar_lea.vmem %s70_s19, 2048  ;;  %p5116_p0 = scmp.lt.s32.totalorder %s70_s19, %s70_s19 }
  0x42   :  { %p5112_p13 = scmp.ne.s32.totalorder %s70_s19, %s5111_s2  ;;  %p5117_p1 = scmp.lt.s32.totalorder %s5111_s2, %s5111_s2 }
  0x44   :  { %p5118_p2 = por %p5117_p1, %p5116_p0 }
  0x46   :  { %p5119_p3 = pnand %p5118_p2, %p5112_p13 }
  0x48   :  { %5122 = shalt.err (!%p5119_p3)
}
  0x49   :  { %75 = dma.hbm_to_vmem [thread:$0]  %s6170_s9, 2048, %s70_s19, [#allocation6], %s5180_s25, %s5180_s25, %s5181_s1  }
  0x4a   :  { %s5123_s24 = scalar_lea.hbm %s6174_s13, 2048 }
  0x4b   :  { %p5124_p4 = scmp.ne.s32.totalorder %s6174_s13, %s5123_s24  ;;  %p5127_p5 = scmp.lt.u32.totalorder %s5123_s24, %s6174_s13 }
  0x4d   :  { %p5129_p6 = pnand %p5127_p5, %p5124_p4 }
  0x4f   :  { %5132 = shalt.err (!%p5129_p6)
}
  0x50   :  { %s5133_s22 = scalar_lea.vmem %s98_s20, 2048  ;;  %p5138_p8 = scmp.lt.s32.totalorder %s98_s20, %s98_s20 }
  0x51   :  { %p5134_p7 = scmp.ne.s32.totalorder %s98_s20, %s5133_s22  ;;  %p5139_p9 = scmp.lt.s32.totalorder %s5133_s22, %s5133_s22 }
  0x53   :  { %p5140_p10 = por %p5139_p9, %p5138_p8 }
  0x55   :  { %p5141_p11 = pnand %p5140_p10, %p5134_p7 }
  0x57   :  { %5144 = shalt.err (!%p5141_p11)
}
  0x58   :  { %103 = dma.hbm_to_vmem [thread:$0]  %s6174_s13, 2048, %s98_s20, [#allocation9], %s5180_s25, %s5180_s25, %s5181_s1  }
  0x59   :  { %5167 = dma.done.wait [#allocation3], 1024  }
  0x5a   :  { %5168 = vsyncadd [#allocation3], 4294966272 }
  0x5b   :  { %5169 = dma.done.wait [#allocation6], 8192  }
  0x5c   :  { %5170 = vsyncadd [#allocation6], 4294959104 }
  0x5d   :  { %5171 = dma.done.wait [#allocation9], 4096  }
  0x5e   :  { %5172 = vsyncadd [#allocation9], 4294963200  ;;  %v308_v0 = vlaneseq  ;;  %v5184_v1 = vmov 0.0|0.0   ;;  %vm5185_vm0 = vmmov 0   ;;  %v5186_v3 = vmov 0.0   ;;  %s6183_s1 = sld [smem:[#allocation16_spill]] }
  0x5f   :  { %4748 = vmatprep.subr.bf16.mxu1 %v5184_v1  ;;  %4724 = vmatprep.subr.bf16.mxu0 %v5184_v1  ;;  %s6184_s26 = sld [smem:[#allocation17_spill]]  ;;  %v221_v8 = vld [vmem:[#allocation8] sm:$0xff]  ;;  %v222_v11 = vld [vmem:[#allocation8 + $0x8] sm:$0xff]  ;;  %v223_v12 = vld [vmem:[#allocation8 + $0x10] sm:$0xff]  ;;  %vm330_vm1 = vcmask 523264   ;;  %vm432_vm6 = vcmask 1041409  }
  0x60   :  { %v5355_v2 = vshrl.u32 %v308_v0, 7  ;;  %4383 = vmatprep.mubr.msk.f32.mxu1 %vm5185_vm0, %v5186_v3  ;;  %4348 = vmatprep.mubr.msk.f32.mxu0 %vm5185_vm0, %v5186_v3  ;;  %v224_v13 = vld [vmem:[#allocation8 + $0x18] sm:$0xff]  ;;  %v4749_v14 = vpack.c.bf16 %v222_v11, %v221_v8  ;;  %v134_v17 = vld [vmem:[%s6164_s3] sm:$0xff]  ;;  %v135_v18 = vld [vmem:[%s6164_s3 + $0x8] sm:$0xff]  ;;  %vm435_vm7 = vcmask 58368   ;;  %vm714_vm8 = vcmask 1040384  }
  0x61   :  { %v4752_v19 = vpack.c.bf16 %v224_v13, %v223_v12  ;;  %v4725_v20 = vpack.c.bf16 %v135_v18, %v134_v17  ;;  %v136_v21 = vld [vmem:[%s6164_s3 + $0x10] sm:$0xff]  ;;  %v225_v22 = vld [vmem:[#allocation8 + $0x20] sm:$0xff]  ;;  %v226_v23 = vld [vmem:[#allocation8 + $0x28] sm:$0xff]  ;;  %vm717_vm9 = vcmask 1041408   ;;  %s5189_s27 = smov [#allocation11]  }
  0x62   :  { %v5362_v4 = vsub.s32 0, %v5355_v2  ;;  %v5365_v5 = vsub.s32 1, %v5355_v2  ;;  %4750 = vmatpush3.bf16.msra.mxu1 %v4749_v14  ;;  %v137_v24 = vld [vmem:[%s6164_s3 + $0x18] sm:$0xff]  ;;  %v138_v26 = vld [vmem:[%s6164_s3 + $0x20] sm:$0xff]  ;;  %v139_v27 = vld [vmem:[%s6164_s3 + $0x28] sm:$0xff]  ;;  %v4755_v28 = vpack.c.bf16 %v226_v23, %v225_v22  ;;  %s4066_s0 = sshll.u32 %s5189_s27, 4  ;;  %s4067_s0 = int_to_ptr.vmem [resolvable:$true] %s4066_s0 }
  0x63   :  { %4751 = vmatprep.subr.bf16.mxu1 %v5184_v1  ;;  %4726 = vmatpush3.bf16.msra.mxu0 %v4725_v20  ;;  %v4728_v25 = vpack.c.bf16 %v137_v24, %v136_v21  ;;  %v227_v29 = vld [vmem:[#allocation8 + $0x30] sm:$0xff]  ;;  %v228_v30 = vld [vmem:[#allocation8 + $0x38] sm:$0xff]  ;;  %v4731_v31 = vpack.c.bf16 %v139_v27, %v138_v26  ;;  %v229_v35 = vld [vmem:[#allocation8 + $0x40] sm:$0xff]  ;;  %p5150_p13 = scmp.lt.s32.totalorder %s4067_s0, %s4067_s0 }
  0x64   :  { %v307_v6 = vld [vmem:[%s6183_s1] sm:$0x3]  ;;  %4727 = vmatprep.subr.bf16.mxu0 %v5184_v1  ;;  %v140_v32 = vld [vmem:[%s6164_s3 + $0x30] sm:$0xff]  ;;  %v141_v33 = vld [vmem:[%s6164_s3 + $0x38] sm:$0xff]  ;;  %v4758_v34 = vpack.c.bf16 %v228_v30, %v227_v29 }
  0x65   :  { %v515_v7 = vld [vmem:[%s6184_s26] sm:$0x3]  ;;  %v313_v9 = vrot.slane %v307_v6, %v5362_v4  ;;  %v320_v15 = vrot.slane %v307_v6, %v5365_v5  ;;  %v230_v36 = vld [vmem:[#allocation8 + $0x48] sm:$0xff]  ;;  %v4734_v37 = vpack.c.bf16 %v141_v33, %v140_v32  ;;  %v231_v41 = vld [vmem:[#allocation8 + $0x50] sm:$0xff] }
  0x66   :  { %v519_v10 = vrot.slane %v515_v7, %v5362_v4  ;;  %v526_v16 = vrot.slane %v515_v7, %v5365_v5  ;;  %4753 = vmatpush3.bf16.msra.mxu1 %v4752_v19  ;;  %v142_v38 = vld [vmem:[%s6164_s3 + $0x40] sm:$0xff]  ;;  %v143_v39 = vld [vmem:[%s6164_s3 + $0x48] sm:$0xff]  ;;  %v4761_v40 = vpack.c.bf16 %v230_v36, %v229_v35  ;;  %v232_v42 = vld [vmem:[#allocation8 + $0x58] sm:$0xff] }
  0x67   :  { %315 = vbcast.lane.b32.xlu0 %v313_v9, 256  ;;  %4754 = vmatprep.subr.bf16.mxu1 %v5184_v1  ;;  %v4737_v43 = vpack.c.bf16 %v143_v39, %v142_v38  ;;  %v144_v44 = vld [vmem:[%s6164_s3 + $0x50] sm:$0xff]  ;;  %v145_v45 = vld [vmem:[%s6164_s3 + $0x58] sm:$0xff]  ;;  %v4764_v46 = vpack.c.bf16 %v232_v42, %v231_v41  ;;  %v233_v47 = vld [vmem:[#allocation8 + $0x60] sm:$0xff] }
  0x68   :  { %521 = vbcast.lane.b32.xlu1 %v519_v10, 256  ;;  %4729 = vmatpush3.bf16.msra.mxu0 %v4728_v25  ;;  %v234_v48 = vld [vmem:[#allocation8 + $0x68] sm:$0xff]  ;;  %v4740_v49 = vpack.c.bf16 %v145_v45, %v144_v44  ;;  %v146_v50 = vld [vmem:[%s6164_s3 + $0x60] sm:$0xff]  ;;  %v235_v53 = vld [vmem:[#allocation8 + $0x70] sm:$0xff] }
  0x69   :  { %4730 = vmatprep.subr.bf16.mxu0 %v5184_v1  ;;  %v147_v51 = vld [vmem:[%s6164_s3 + $0x68] sm:$0xff]  ;;  %v4767_v52 = vpack.c.bf16 %v234_v48, %v233_v47  ;;  %v236_v54 = vld [vmem:[#allocation8 + $0x78] sm:$0xff]  ;;  %v125_v55 = vld [vmem:[#allocation2] sm:$0xff] }
  0x6a   :  { %4756 = vmatpush3.bf16.msra.mxu1 %v4755_v28  ;;  %v126_v56 = vld [vmem:[#allocation2 + $0x8] sm:$0xff]  ;;  %v4743_v57 = vpack.c.bf16 %v147_v51, %v146_v50  ;;  %v148_v58 = vld [vmem:[%s6164_s3 + $0x70] sm:$0xff]  ;;  %v149_v59 = vld [vmem:[%s6164_s3 + $0x78] sm:$0xff]  ;;  %v4770_v60 = vpack.c.bf16 %v236_v54, %v235_v53  ;;  %v5187_v50 = vmov 0  }
  0x6b   :  { %322 = vbcast.lane.b32.xlu0 %v320_v15, 256  ;;  %4757 = vmatprep.subr.bf16.mxu1 %v5184_v1  ;;  %v4772_v61 = vpack.c.bf16 %v126_v56, %v125_v55  ;;  %v127_v62 = vld [vmem:[#allocation2 + $0x10] sm:$0xff]  ;;  %v128_v63 = vld [vmem:[#allocation2 + $0x18] sm:$0xff]  ;;  %v4746_v6 = vpack.c.bf16 %v149_v59, %v148_v58  ;;  %v220_v7 = vld [vmem:[%s6173_s12] sm:$0x1] }
  0x6c   :  { %528 = vbcast.lane.b32.xlu1 %v526_v16, 256  ;;  %4732 = vmatpush3.bf16.msra.mxu0 %v4731_v31  ;;  %v4776_v8 = vpack.c.bf16 %v128_v63, %v127_v62  ;;  %v129_v9 = vld [vmem:[#allocation2 + $0x20] sm:$0xff]  ;;  %v130_v10 = vld [vmem:[#allocation2 + $0x28] sm:$0xff]  ;;  %v131_v13 = vld [vmem:[#allocation2 + $0x30] sm:$0xff]  ;;  %v5447_v16 = vand.u32 127, %v308_v0 }
  0x6d   :  { %4733 = vmatprep.subr.bf16.mxu0 %v5184_v1  ;;  %v133_v11 = vld [vmem:[%s6165_s4] sm:$0x1]  ;;  %v4780_v12 = vpack.c.bf16 %v130_v10, %v129_v9  ;;  %v132_v14 = vld [vmem:[#allocation2 + $0x38] sm:$0xff]  ;;  %4948 = vset.pattern.permute.xlu0 %v5187_v50 }
  0x6e   :  { %4759 = vmatpush3.bf16.msra.mxu1 %v4758_v34  ;;  %v4784_v15 = vpack.c.bf16 %v132_v14, %v131_v13  ;;  %4947 = vset.pattern.permute.xlu1 %v5187_v50  ;;  %vm981_vm10 = vcmp.ge.s32.totalorder %v5447_v16, 16  ;;  %vm989_vm11 = vcmp.lt.s32.totalorder %v5447_v16, 32  ;;  %vm982_vm12 = vcmp.ge.s32.totalorder %v5447_v16, 32 }
  0x6f   :  { %4760 = vmatprep.subr.bf16.mxu1 %v5184_v1  ;;  %vm988_vm13 = vcmp.lt.s32.totalorder %v5447_v16, 16  ;;  %vm990_vm14 = vcmp.lt.s32.totalorder %v5447_v16, 48  ;;  %vm983_vm15 = vcmp.ge.s32.totalorder %v5447_v16, 48 }
  0x70   :  { %4735 = vmatpush3.bf16.msra.mxu0 %v4734_v37  ;;  %v5481_v37 = vsub.s32 %v5447_v16, %v5355_v2 }
  0x71   :  { %4736 = vmatprep.subr.bf16.mxu0 %v5184_v1 }
  0x72   :  { %4762 = vmatpush3.bf16.msra.mxu1 %v4761_v40 }
  0x73   :  { %4763 = vmatprep.subr.bf16.mxu1 %v5184_v1 }
  0x74   :  { %4738 = vmatpush3.bf16.msra.mxu0 %v4737_v43 }
  0x75   :  { %4739 = vmatprep.subr.bf16.mxu0 %v5184_v1 }
  0x76   :  { %4765 = vmatpush3.bf16.msra.mxu1 %v4764_v46 }
  0x77   :  { %4766 = vmatprep.subr.bf16.mxu1 %v5184_v1 }
  0x78   :  { %4741 = vmatpush3.bf16.msra.mxu0 %v4740_v49 }
  0x79   :  { %4742 = vmatprep.subr.bf16.mxu0 %v5184_v1 }
  0x7a   :  { %4768 = vmatpush3.bf16.msra.mxu1 %v4767_v52 }
  0x7b   :  { %4769 = vmatprep.subr.bf16.mxu1 %v5184_v1 }
  0x7c   :  { %4744 = vmatpush3.bf16.msra.mxu0 %v4743_v57 }
  0x7d   :  { %4745 = vmatprep.subr.bf16.mxu0 %v5184_v1 }
  0x7e   :  { %4771 = vmatpush3.bf16.msra.mxu1 %v4770_v60 }
  0x7f   :  { %4773 = vmatprep.subr.bf16.mxu1 %v4772_v61 }
  0x80   :  { %4747 = vmatpush3.bf16.msra.mxu0 %v4746_v6 }
  0x81   :  { %4384 = vmatmul.mubr.f32.vlgmr.msra.gmra.mrb[0].mxu1 %v220_v7 }
  0x82   :  { %4775 = vmatpush3.bf16.msra.mxu1 %v4772_v61 }
  0x83   :  { %4777 = vmatprep.subr.bf16.mxu1 %v4776_v8  ;;  %4349 = vmatmul.mubr.f32.vlgmr.msra.gmra.mrb[0].mxu0 %v133_v11 }
  0x84   :  { %903 = vmatprep.mubr.f32.mxu0 %v5186_v3 }
  0x86   :  { %4779 = vmatpush3.bf16.msra.mxu1 %v4776_v8 }
  0x87   :  { %4781 = vmatprep.subr.bf16.mxu1 %v4780_v12 }
  0x8a   :  { %4783 = vmatpush3.bf16.msra.mxu1 %v4780_v12 }
  0x8b   :  { %4785 = vmatprep.subr.bf16.mxu1 %v4784_v15 }
  0x8e   :  { %4787 = vmatpush3.bf16.msra.mxu1 %v4784_v15 }
  0x8f   :  { %4789 = vmatprep.subr.bf16.mxu1 %v4772_v61 }
  0xd9   :  { %v316_v17 = vpop.permute.xlu0 %315 }
  0xda   :  { %v522_v18 = vpop.permute.xlu1 %521  ;;  %vm324_vm2 = vcmp.eq.s32.totalorder %v316_v17, %v5447_v16 }
  0xdb   :  { %v4077_v19 = vsel %vm324_vm2, 1.0, %v5186_v3  ;;  %vm530_vm3 = vcmp.eq.s32.totalorder %v522_v18, %v5447_v16  ;;  %vm5575_vm2 = vmand %vm981_vm10, %vm989_vm11  ;;  %vm986_vm11 = vcmp.ge.s32.totalorder %v5447_v16, 96 }
  0xdc   :  { %4402 = vmatprep.mubr.msk.f32.mxu1 %vm330_vm1, %v4077_v19  ;;  %v4081_v21 = vsel %vm530_vm3, 1.0, %v5186_v3  ;;  %vm984_vm3 = vcmp.ge.s32.totalorder %v5447_v16, 64 }
  0xdd   :  { %v323_v20 = vpop.permute.xlu0 %322 }
  0xde   :  { %vm325_vm4 = vcmp.eq.s32.totalorder %v323_v20, %v5447_v16  ;;  %v529_v0 = vpop.permute.xlu1 %528 }
  0xdf   :  { %v4078_v22 = vsel %vm325_vm4, 1.0, %v5186_v3  ;;  %vm531_vm5 = vcmp.eq.s32.totalorder %v529_v0, %v5447_v16  ;;  %vm992_vm4 = vcmp.lt.s32.totalorder %v5447_v16, 80 }
  0xe0   :  { %4403 = vmatmul.mubr.msk.f32.vlgmr.msra.gmra.mrb[2].mxu1 %vm330_vm1, %v4078_v22  ;;  %v4082_v23 = vsel %vm531_vm5, 1.0, %v5186_v3  ;;  %vm5589_vm5 = vmand %vm982_vm12, %vm990_vm14  ;;  %vm987_vm14 = vcmp.ge.s32.totalorder %v5447_v16, 112 }
  0xe1   :  { %4791 = vmatpush3.bf16.msra.mxu1 %v4772_v61  ;;  %4421 = vmatprep.mubr.msk.f32.mxu1 %vm330_vm1, %v4081_v21  ;;  %vm1000_vm12 = vmand %vm984_vm3, %vm992_vm4  ;;  %vm2398_vm3 = vcmask 15360  }
  0xe2   :  { %4793 = vmatprep.subr.bf16.mxu1 %v4776_v8 }
  0xe5   :  { %4795 = vmatpush3.bf16.msra.mxu1 %v4776_v8 }
  0xe6   :  { %4797 = vmatprep.subr.bf16.mxu1 %v4780_v12 }
  0xe9   :  { %4799 = vmatpush3.bf16.msra.mxu1 %v4780_v12 }
  0xea   :  { %4801 = vmatprep.subr.bf16.mxu1 %v4784_v15 }
  0xed   :  { %4803 = vmatpush3.bf16.msra.mxu1 %v4784_v15 }
  0xee   :  { %4836 = vmatprep.subr.bf16.mxu1 %v5184_v1 }
  0xf0   :  { %4422 = vmatmul.mubr.msk.f32.vlgmr.msra.gmra.mrb[4].mxu1 %vm330_vm1, %v4082_v23  ;;  %vm991_vm1 = vcmp.lt.s32.totalorder %v5447_v16, 64 }
  0xf1   :  { %4456 = vmatprep.mubr.msk.f32.mxu1 %vm5185_vm0, %v5186_v3  ;;  %vm5599_vm10 = vmand %vm983_vm15, %vm991_vm1 }
 0x154   :  { %v5464_v24 = vpop.f32.mrb[0].mxu1 }
 0x155   :  { %v4385_v25 = vpop.f32.mrb[1].mxu1 }
 0x156   :  { %v216_v26 = vpop.f32.mrb[0].mxu0 }
 0x157   :  { %v4350_v27 = vpop.f32.mrb[1].mxu0  ;;  %v415_v28 = vrot.slane %v216_v26, %v5362_v4 }
 0x1b3   :  { %v5467_v29 = vpop.f32.mrb[2].mxu1 }
 0x1b4   :  { %v5469_v30 = vpop.f32.mrb[3].mxu1  ;;  %v417_v31 = vmul.f32 %v5467_v29, %v415_v28 }
 0x1b5   :  { %v416_v32 = vmul.f32 %v415_v28, %v5469_v30 }
 0x1b6   :  { %420 = vadd.xlane.f32.xlu1 %v417_v31 }
 0x1b7   :  { %418 = vadd.xlane.f32.xlu0 %v416_v32 }
 0x1c3   :  { %v5473_v33 = vpop.f32.mrb[4].mxu1 }
 0x1c4   :  { %v5475_v34 = vpop.f32.mrb[5].mxu1  ;;  %v618_v35 = vmul.f32 %v5473_v33, %v415_v28 }
 0x1c5   :  { %v617_v36 = vmul.f32 %v5475_v34, %v415_v28 }
 0x1c7   :  { %619 = vadd.xlane.f32.xlu0 %v617_v36 }
 0x1cb   :  { %621 = vadd.xlane.f32.xlu0 %v618_v35 }
 0x243   :  { %v421_v38 = vpop.xlane.xlu1 %420 }
 0x244   :  { %v431_v39 = vrot.slane %v421_v38, %v5481_v37  ;;  %v419_v40 = vpop.xlane.xlu0 %418 }
 0x245   :  { %v427_v41 = vrot.slane %v419_v40, %v5481_v37 }
 0x247   :  { %v433_v42 = vsel %vm432_vm6, %v431_v39, %v427_v41 }
 0x248   :  { %v436_v43 = vsel %vm435_vm7, %v433_v42, -inf }
 0x249   :  { %437 = vmax.xlane.f32.xlu1 %v436_v43 }
 0x254   :  { %v620_v44 = vpop.xlane.xlu0 %619 }
 0x255   :  { %v628_v46 = vrot.slane %v620_v44, %v5481_v37 }
 0x258   :  { %v622_v45 = vpop.xlane.xlu0 %621 }
 0x259   :  { %v632_v47 = vrot.slane %v622_v45, %v5481_v37 }
 0x25b   :  { %v633_v48 = vsel %vm432_vm6, %v632_v47, %v628_v46 }
 0x25c   :  { %v635_v49 = vsel %vm435_vm7, %v633_v48, -inf }
 0x25d   :  { %636 = vmax.xlane.f32.xlu0 %v635_v49 }
 0x2d6   :  { %v438_v51 = vpop.xlane.xlu1 %437 }
 0x2d7   :  { %v443_v52 = vrot.slane %v438_v51, %v5362_v4  ;;  %v447_v53 = vrot.slane %v438_v51, %v5365_v5 }
 0x2d9   :  { %v450_v54 = vsub.f32 %v419_v40, %v443_v52  ;;  %v451_v55 = vsub.f32 %v421_v38, %v447_v53 }
 0x2db   :  { %v452_v56 = vmul.f32 1.442695, %v450_v54  ;;  %v454_v57 = vmul.f32 1.442695, %v451_v55 }
 0x2dd   :  { %4949 = vpow2.f32 %v452_v56 }
 0x2de   :  { %4951 = vpow2.f32 %v454_v57 }
 0x2e7   :  { %v4950_v58 = vpop.eup %4949 }
 0x2e8   :  { %v4952_v59 = vpop.eup %4951  ;;  %459 = vperm.xlu1 %4947, %v4950_v58  }
 0x2e9   :  { %462 = vperm.xlu0 %4948, %v4952_v59  }
 0x2ea   :  { %v637_v60 = vpop.xlane.xlu0 %636 }
 0x2eb   :  { %v642_v61 = vrot.slane %v637_v60, %v5362_v4  ;;  %v646_v62 = vrot.slane %v637_v60, %v5365_v5 }
 0x2ed   :  { %v649_v63 = vsub.f32 %v620_v44, %v642_v61  ;;  %v650_v6 = vsub.f32 %v622_v45, %v646_v62 }
 0x2ef   :  { %v651_v7 = vmul.f32 1.442695, %v649_v63  ;;  %v653_v8 = vmul.f32 1.442695, %v650_v6 }
 0x2f1   :  { %4953 = vpow2.f32 %v651_v7 }
 0x2f2   :  { %4955 = vpow2.f32 %v653_v8 }
 0x2fb   :  { %v4954_v9 = vpop.eup %4953 }
 0x2fc   :  { %658 = vperm.xlu1 %4947, %v4954_v9   ;;  %v4956_v10 = vpop.eup %4955 }
 0x300   :  { %661 = vperm.xlu1 %4947, %v4956_v10  }
 0x367   :  { %v460_v11 = vpop.permute.xlu1 %459 }
 0x368   :  { %v467_v12 = vrot.slane %v460_v11, %v5481_v37  ;;  %v463_v13 = vpop.permute.xlu0 %462 }
 0x369   :  { %v471_v14 = vrot.slane %v463_v13, %v5481_v37 }
 0x36b   :  { %v472_v15 = vsel %vm432_vm6, %v471_v14, %v467_v12 }
 0x36c   :  { %v474_v17 = vsel %vm435_vm7, %v472_v15, 0.0  ;;  %v764_v15 = vld [vmem:[#allocation5 + $0x8] sm:$0xff] }
 0x36d   :  { %475 = vadd.xlane.f32.xlu1 %v474_v17  ;;  %v767_v17 = vld [vmem:[#allocation5 + $0x20] sm:$0xff] }
 0x37b   :  { %v659_v18 = vpop.permute.xlu1 %658 }
 0x37c   :  { %v666_v20 = vrot.slane %v659_v18, %v5481_v37  ;;  %v763_v18 = vld [vmem:[#allocation5] sm:$0xff] }
 0x37f   :  { %v662_v19 = vpop.permute.xlu1 %661 }
 0x380   :  { %v670_v21 = vrot.slane %v662_v19, %v5481_v37  ;;  %v4804_v19 = vpack.c.bf16 %v767_v17, %v764_v15  ;;  %v794_v17 = vld [vmem:[#allocation5 + $0xf8] sm:$0xff] }
 0x382   :  { %v671_v22 = vsel %vm432_vm6, %v670_v21, %v666_v20  ;;  %v766_v20 = vld [vmem:[#allocation5 + $0x18] sm:$0xff]  ;;  %v765_v21 = vld [vmem:[#allocation5 + $0x10] sm:$0xff]  ;;  %4805 = vmatprep.subr.bf16.mxu0 %v4804_v19 }
 0x383   :  { %v673_v0 = vsel %vm435_vm7, %v671_v22, 0.0  ;;  %v768_v22 = vld [vmem:[#allocation5 + $0x28] sm:$0xff]  ;;  %vm985_vm7 = vcmp.ge.s32.totalorder %v5447_v16, 80 }
 0x384   :  { %674 = vadd.xlane.f32.xlu0 %v673_v0  ;;  %v4806_v0 = vpack.c.bf16 %v766_v20, %v763_v18  ;;  %v797_v18 = vld [vmem:[#allocation5 + $0x110] sm:$0xff] }
 0x385   :  { %v4824_v19 = vpack.c.bf16 %v797_v18, %v794_v17  ;;  %v793_v20 = vld [vmem:[#allocation5 + $0xf0] sm:$0xff] }
 0x386   :  { %4807 = vmatpush1.bf16.msra.mxu0 %v4806_v0 }
 0x3fa   :  { %v476_v23 = vpop.xlane.xlu1 %475 }
 0x3fb   :  { %4957 = vrcp.f32 %v476_v23  ;;  %v4837_v23 = vpack.c.bf16 %v768_v22, %v765_v21  ;;  %v796_v21 = vld [vmem:[#allocation5 + $0x108] sm:$0xff]  ;;  %v795_v22 = vld [vmem:[#allocation5 + $0x100] sm:$0xff] }
 0x3fc   :  { %v4826_v0 = vpack.c.bf16 %v796_v21, %v793_v20 }
 0x3fd   :  { %4838 = vmatpush3.bf16.msra.mxu1 %v4837_v23  ;;  %v798_v23 = vld [vmem:[#allocation5 + $0x118] sm:$0xff] }
 0x3fe   :  { %4839 = vmatprep.subr.bf16.mxu1 %v5184_v1 }
 0x405   :  { %v4958_v25 = vpop.eup %4957 }
 0x406   :  { %v486_v26 = vrot.slane %v4958_v25, %v5365_v5  ;;  %v482_v27 = vrot.slane %v4958_v25, %v5362_v4 }
 0x408   :  { %v490_v28 = vmul.f32 %v4952_v59, %v486_v26  ;;  %v489_v31 = vmul.f32 %v4950_v58, %v482_v27 }
 0x40a   :  { %498 = vperm.xlu0 %4948, %v490_v28   ;;  %493 = vperm.xlu1 %4947, %v489_v31  }
 0x411   :  { %v675_v32 = vpop.xlane.xlu0 %674 }
 0x412   :  { %4959 = vrcp.f32 %v675_v32 }
 0x41c   :  { %v4960_v35 = vpop.eup %4959 }
 0x41d   :  { %v681_v36 = vrot.slane %v4960_v35, %v5362_v4  ;;  %v685_v39 = vrot.slane %v4960_v35, %v5365_v5 }
 0x41f   :  { %v688_v38 = vmul.f32 %v4954_v9, %v681_v36  ;;  %v689_v40 = vmul.f32 %v4956_v10, %v685_v39 }
 0x421   :  { %692 = vperm.xlu1 %4947, %v688_v38  }
 0x425   :  { %697 = vperm.xlu1 %4947, %v689_v40   ;;  %v770_v40 = vld [vmem:[#allocation5 + $0x38] sm:$0xff] }
 0x489   :  { %v494_v41 = vpop.permute.xlu1 %493  ;;  %v499_v43 = vpop.permute.xlu0 %498 }
 0x48a   :  { %v501_v42 = vmul.f32 %v494_v41, %v5469_v30  ;;  %v502_v45 = vmul.f32 %v5467_v29, %v499_v43  ;;  %v773_v41 = vld [vmem:[#allocation5 + $0x50] sm:$0xff] }
 0x48b   :  { %v769_v43 = vld [vmem:[#allocation5 + $0x30] sm:$0xff] }
 0x48c   :  { %v503_v44 = vrot.slane %v501_v42, 4  ;;  %v509_v47 = vrot.slane %v502_v45, 4 }
 0x48e   :  { %v504_v46 = vadd.f32 %v503_v44, %v501_v42  ;;  %v510_v50 = vadd.f32 %v509_v47, %v502_v45  ;;  %v4808_v42 = vpack.c.bf16 %v773_v41, %v770_v40  ;;  %v772_v44 = vld [vmem:[#allocation5 + $0x48] sm:$0xff]  ;;  %v771_v45 = vld [vmem:[#allocation5 + $0x40] sm:$0xff]  ;;  %v774_v47 = vld [vmem:[#allocation5 + $0x58] sm:$0xff] }
 0x490   :  { %v505_v49 = vrot.slane %v504_v46, 2  ;;  %v511_v55 = vrot.slane %v510_v50, 2  ;;  %4809 = vmatprep.subr.bf16.mxu0 %v4808_v42  ;;  %v806_v42 = vld [vmem:[#allocation5 + $0x158] sm:$0xff] }
 0x492   :  { %v506_v54 = vadd.f32 %v505_v49, %v504_v46  ;;  %v512_v60 = vadd.f32 %v511_v55, %v510_v50  ;;  %v4810_v46 = vpack.c.bf16 %v772_v44, %v769_v43  ;;  %v776_v49 = vld [vmem:[#allocation5 + $0x68] sm:$0xff]  ;;  %v779_v50 = vld [vmem:[#allocation5 + $0x80] sm:$0xff]  ;;  %v809_v43 = vld [vmem:[#allocation5 + $0x170] sm:$0xff] }
 0x493   :  { %v805_v44 = vld [vmem:[#allocation5 + $0x150] sm:$0xff] }
 0x494   :  { %v507_v59 = vrot.slane %v506_v54, 1  ;;  %v513_v7 = vrot.slane %v512_v60, 1  ;;  %4811 = vmatpush1.bf16.msra.mxu0 %v4810_v46  ;;  %v808_v46 = vld [vmem:[#allocation5 + $0x168] sm:$0xff] }
 0x496   :  { %v508_v6 = vadd.f32 %v507_v59, %v506_v54  ;;  %v514_v11 = vadd.f32 %v513_v7, %v512_v60  ;;  %v777_v54 = vld [vmem:[#allocation5 + $0x70] sm:$0xff]  ;;  %v788_v7 = vld [vmem:[#allocation5 + $0xc8] sm:$0xff] }
 0x497   :  { %v781_v60 = vld [vmem:[#allocation5 + $0x90] sm:$0xff] }
 0x4a0   :  { %v693_v48 = vpop.permute.xlu1 %692 }
 0x4a1   :  { %v700_v51 = vmul.f32 %v693_v48, %v5475_v34  ;;  %v4840_v48 = vpack.c.bf16 %v774_v47, %v771_v45  ;;  %v4832_v45 = vpack.c.bf16 %v809_v43, %v806_v42  ;;  %v807_v47 = vld [vmem:[#allocation5 + $0x160] sm:$0xff]  ;;  %v4090_v43 = vsel %vm5599_vm10, 1.0, %v5186_v3 }
 0x4a3   :  { %v702_v52 = vrot.slane %v700_v51, 4  ;;  %4841 = vmatpush3.bf16.msra.mxu1 %v4840_v48  ;;  %v810_v48 = vld [vmem:[#allocation5 + $0x178] sm:$0xff] }
 0x4a4   :  { %v698_v53 = vpop.permute.xlu1 %697  ;;  %4842 = vmatprep.subr.bf16.mxu1 %v5184_v1 }
 0x4a5   :  { %v703_v56 = vadd.f32 %v702_v52, %v700_v51  ;;  %v701_v57 = vmul.f32 %v5473_v33, %v698_v53  ;;  %v4812_v51 = vpack.c.bf16 %v779_v50, %v776_v49  ;;  %v775_v52 = vld [vmem:[#allocation5 + $0x60] sm:$0xff]  ;;  %v778_v53 = vld [vmem:[#allocation5 + $0x78] sm:$0xff]  ;;  %v4834_v49 = vpack.c.bf16 %v808_v46, %v805_v44 }
 0x4a6   :  { %v4814_v55 = vpack.c.bf16 %v778_v53, %v775_v52  ;;  %v4858_v50 = vpack.c.bf16 %v810_v48, %v807_v47  ;;  %v4091_v44 = vsel %vm1000_vm12, 1.0, %v5186_v3 }
 0x4a7   :  { %v704_v58 = vrot.slane %v703_v56, 2  ;;  %v708_v30 = vrot.slane %v701_v57, 4  ;;  %4813 = vmatprep.subr.bf16.mxu0 %v4812_v51 }
 0x4a8   :  { %4815 = vmatpush1.bf16.msra.mxu0 %v4814_v55 }
 0x4a9   :  { %v705_v61 = vadd.f32 %v704_v58, %v703_v56  ;;  %v709_v29 = vadd.f32 %v708_v30, %v701_v57  ;;  %v780_v56 = vld [vmem:[#allocation5 + $0x88] sm:$0xff]  ;;  %v782_v58 = vld [vmem:[#allocation5 + $0x98] sm:$0xff]  ;;  %v785_v30 = vld [vmem:[#allocation5 + $0xb0] sm:$0xff] }
 0x4aa   :  { %v4843_v57 = vpack.c.bf16 %v780_v56, %v777_v54  ;;  %v4816_v59 = vpack.c.bf16 %v785_v30, %v782_v58  ;;  %v5188_v30 = vmov 1983009808  }
 0x4ab   :  { %v706_v62 = vrot.slane %v705_v61, 1  ;;  %v710_v63 = vrot.slane %v709_v29, 2 }
 0x4ac   :  { %4844 = vmatpush3.bf16.msra.mxu1 %v4843_v57  ;;  %4817 = vmatprep.subr.bf16.mxu0 %v4816_v59  ;;  %v832_v59 = vunpack.c.l.s4 %v5188_v30 }
 0x4ad   :  { %v707_v34 = vadd.f32 %v706_v62, %v705_v61  ;;  %v711_v8 = vadd.f32 %v710_v63, %v709_v29  ;;  %v784_v61 = vld [vmem:[#allocation5 + $0xa8] sm:$0xff]  ;;  %v783_v29 = vld [vmem:[#allocation5 + $0xa0] sm:$0xff]  ;;  %4845 = vmatprep.subr.bf16.mxu1 %v5184_v1  ;;  %v786_v63 = vld [vmem:[#allocation5 + $0xb8] sm:$0xff] }
 0x4ae   :  { %v4818_v62 = vpack.c.bf16 %v784_v61, %v781_v60  ;;  %v4085_v60 = vld [vmem:[%s6166_s5] ss:$0 sm:$0xff] }
 0x4af   :  { %v712_v9 = vrot.slane %v711_v8, 1  ;;  %v5511_v10 = vsel %vm714_vm8, %v508_v6, %v707_v34  ;;  %v4846_v6 = vpack.c.bf16 %v786_v63, %v783_v29  ;;  %v791_v34 = vld [vmem:[#allocation5 + $0xe0] sm:$0xff]  ;;  %v833_v63 = vunpack.c.0.s8 %v832_v59 }
 0x4b0   :  { %v718_v33 = vsel %vm717_vm9, %v5511_v10, 0.0  ;;  %4819 = vmatpush1.bf16.msra.mxu0 %v4818_v62 }
 0x4b1   :  { %v713_v12 = vadd.f32 %v712_v9, %v711_v8  ;;  %719 = vadd.xlane.f32.xlu1 %v718_v33  ;;  %4847 = vmatpush3.bf16.msra.mxu1 %v4846_v6  ;;  %v4820_v8 = vpack.c.bf16 %v791_v34, %v788_v7  ;;  %v787_v9 = vld [vmem:[#allocation5 + $0xc0] sm:$0xff]  ;;  %v790_v33 = vld [vmem:[#allocation5 + $0xd8] sm:$0xff] }
 0x4b2   :  { %4848 = vmatprep.subr.bf16.mxu1 %v5184_v1  ;;  %v4086_v6 = vld [vmem:[%s6167_s6] ss:$0 sm:$0xff] }
 0x4b3   :  { %v5515_v13 = vsel %vm714_vm8, %v514_v11, %v713_v12  ;;  %v789_v11 = vld [vmem:[#allocation5 + $0xd0] sm:$0xff]  ;;  %v4822_v12 = vpack.c.bf16 %v790_v33, %v787_v9  ;;  %4821 = vmatprep.subr.bf16.mxu0 %v4820_v8  ;;  %vm993_vm8 = vcmp.lt.s32.totalorder %v5447_v16, 96 }
 0x4b4   :  { %v721_v14 = vsel %vm717_vm9, %v5515_v13, 0.0  ;;  %vm1001_vm15 = vmand %vm985_vm7, %vm993_vm8 }
 0x4b5   :  { %722 = vadd.xlane.f32.xlu0 %v721_v14  ;;  %v792_v14 = vld [vmem:[#allocation5 + $0xe8] sm:$0xff]  ;;  %4823 = vmatpush1.bf16.msra.mxu0 %v4822_v12  ;;  %v4092_v48 = vsel %vm1001_vm15, 1.0, %v5186_v3 }
 0x4b6   :  { %v4849_v15 = vpack.c.bf16 %v792_v14, %v789_v11  ;;  %4825 = vmatprep.subr.bf16.mxu0 %v4824_v19  ;;  %v811_v11 = vld [vmem:[%s6169_s8] sm:$0x7] }
 0x4b7   :  { %v816_v12 = vrot.slane %v811_v11, %v5362_v4 }
 0x4b8   :  { %4850 = vmatpush3.bf16.msra.mxu1 %v4849_v15  ;;  %v820_v15 = vrot.slane %v811_v11, %v5365_v5 }
 0x4b9   :  { %4851 = vmatprep.subr.bf16.mxu1 %v5184_v1  ;;  %4827 = vmatpush1.bf16.msra.mxu0 %v4826_v0 }
 0x53e   :  { %v720_v25 = vpop.xlane.xlu1 %719 }
 0x53f   :  { %v725_v26 = vmul.f32 0.0078125, %v720_v25  ;;  %v4852_v25 = vpack.c.bf16 %v798_v23, %v795_v22 }
 0x541   :  { %v5521_v27 = vsub.f32 %v5511_v10, %v725_v26  ;;  %v800_v26 = vld [vmem:[#allocation5 + $0x128] sm:$0xff]  ;;  %4853 = vmatpush3.bf16.msra.mxu1 %v4852_v25 }
 0x542   :  { %v723_v28 = vpop.xlane.xlu0 %722  ;;  %4854 = vmatprep.subr.bf16.mxu1 %v5184_v1 }
 0x543   :  { %v726_v31 = vmul.f32 0.0078125, %v723_v28  ;;  %v729_v32 = vmul.f32 %v5521_v27, %v5521_v27  ;;  %v803_v28 = vld [vmem:[#allocation5 + $0x140] sm:$0xff] }
 0x545   :  { %v5526_v35 = vsub.f32 %v5515_v13, %v726_v31  ;;  %v731_v36 = vsel %vm717_vm9, %v729_v32, 0.0  ;;  %v799_v31 = vld [vmem:[#allocation5 + $0x120] sm:$0xff]  ;;  %v4828_v32 = vpack.c.bf16 %v803_v28, %v800_v26  ;;  %v5585_v28 = vsel %vm988_vm13, 1.0, %v5186_v3 }
 0x546   :  { %732 = vadd.xlane.f32.xlu1 %v731_v36  ;;  %v802_v36 = vld [vmem:[#allocation5 + $0x138] sm:$0xff]  ;;  %vm994_vm13 = vcmp.lt.s32.totalorder %v5447_v16, 112  ;;  %v4089_v16 = vsel %vm5589_vm5, 1.0, %v5186_v3 }
 0x547   :  { %v730_v38 = vmul.f32 %v5526_v35, %v5526_v35  ;;  %v4830_v40 = vpack.c.bf16 %v802_v36, %v799_v31  ;;  %4829 = vmatprep.subr.bf16.mxu0 %v4828_v32  ;;  %vm1002_vm1 = vmand %vm986_vm11, %vm994_vm13 }
 0x549   :  { %v734_v39 = vsel %vm717_vm9, %v730_v38, 0.0  ;;  %v801_v38 = vld [vmem:[#allocation5 + $0x130] sm:$0xff]  ;;  %4831 = vmatpush1.bf16.msra.mxu0 %v4830_v40 }
 0x54a   :  { %735 = vadd.xlane.f32.xlu1 %v734_v39  ;;  %v804_v39 = vld [vmem:[#allocation5 + $0x148] sm:$0xff]  ;;  %4833 = vmatprep.subr.bf16.mxu0 %v4832_v45  ;;  %v5633_v45 = vsel %vm987_vm14, 1.0, %v5186_v3 }
 0x54b   :  { %v4855_v41 = vpack.c.bf16 %v804_v39, %v801_v38 }
 0x54d   :  { %4856 = vmatpush3.bf16.msra.mxu1 %v4855_v41  ;;  %4835 = vmatpush1.bf16.msra.mxu0 %v4834_v49  ;;  %v4088_v41 = vsel %vm5575_vm2, 1.0, %v5186_v3  ;;  %vm2221_vm2 = vcmask 9216  }
 0x54e   :  { %4857 = vmatprep.subr.bf16.mxu1 %v5184_v1  ;;  %4459 = vmatprep.subr.mxu0 %v5186_v3 }
 0x551   :  { %4859 = vmatpush3.bf16.msra.mxu1 %v4858_v50  ;;  %v5646_v50 = vsel %vm1002_vm1, 1.0, %v5186_v3 }
 0x552   :  { %4464 = vmatprep.subr.mxu1 %v5186_v3 }
 0x5d3   :  { %v733_v51 = vpop.xlane.xlu1 %732 }
 0x5d4   :  { %v737_v52 = vmul.f32 0.0078125, %v733_v51 }
 0x5d6   :  { %v739_v53 = vadd.f32 1e-05, %v737_v52 }
 0x5d7   :  { %v736_v54 = vpop.xlane.xlu1 %735 }
 0x5d8   :  { %4961 = vrsqrt.f32 %v739_v53  ;;  %v738_v55 = vmul.f32 0.0078125, %v736_v54 }
 0x5da   :  { %v740_v56 = vadd.f32 1e-05, %v738_v55 }
 0x5dc   :  { %4963 = vrsqrt.f32 %v740_v56 }
 0x5e2   :  { %v4962_v57 = vpop.eup %4961 }
 0x5e3   :  { %v743_v58 = vmul.f32 %v4962_v57, %v5521_v27  ;;  %v5549_v27 = vsub.s32 %v833_v63, %v5355_v2 }
 0x5e5   :  { %v752_v62 = vmul.f32 %v4085_v60, %v743_v58 }
 0x5e6   :  { %v4964_v61 = vpop.eup %4963 }
 0x5e7   :  { %v744_v29 = vmul.f32 %v4964_v61, %v5526_v35  ;;  %v761_v34 = vadd.f32 %v4086_v6, %v752_v62  ;;  %v823_v35 = vsub.s32 2, %v5355_v2 }
 0x5e9   :  { %v753_v7 = vmul.f32 %v4085_v60, %v744_v29  ;;  %v824_v14 = vrot.slane %v811_v11, %v823_v35 }
 0x5eb   :  { %v762_v8 = vadd.f32 %v4086_v6, %v753_v7 }
 0x5ed   :  { %v830_v9 = vcombine.low %v761_v34, %v762_v8 }
 0x5ef   :  { %v837_v33 = vrot.slane %v830_v9, %v5549_v27 }
 0x5f1   :  { %904 = vmatmul.mubr.f32.vlgmr.msra.gmra.mrb[2].mxu0 %v837_v33  ;;  %4457 = vmatmul.mubr.f32.vlgmr.msra.gmra.mrb[6].mxu1 %v837_v33 }
 0x5f2   :  { %4461 = vmatprep.mubr.msk.f32.mxu0 %vm5185_vm0, %v5186_v3  ;;  %4466 = vmatprep.mubr.msk.f32.mxu1 %vm5185_vm0, %v5186_v3 }
 0x6c4   :  { %v905_v17 = vpop.f32.mrb[2].mxu0  ;;  %v976_v18 = vpop.f32.mrb[6].mxu1 }
 0x6c5   :  { %v906_v19 = vadd.f32 %v905_v17, %v816_v12  ;;  %v977_v20 = vadd.f32 %v976_v18, %v824_v14  ;;  %v907_v2 = vpop.f32.mrb[3].mxu0  ;;  %v4458_v21 = vpop.f32.mrb[7].mxu1 }
 0x6c6   :  { %v908_v22 = vadd.f32 %v907_v2, %v820_v15 }
 0x6c7   :  { %v5570_v0 = vrot.slane %v906_v19, %v5549_v27  ;;  %v5573_v23 = vrot.slane %v977_v20, %v5549_v27 }
 0x6c8   :  { %v5582_v26 = vrot.slane %v908_v22, %v5549_v27 }
 0x6c9   :  { %v5597_v32 = vcombine.high %v5570_v0, %v5570_v0  ;;  %v5613_v39 = vcombine.high %v5573_v23, %v5573_v23  ;;  %v1031_v40 = vmul.f32 %v5585_v28, %v5570_v0  ;;  %v1033_v46 = vmul.f32 %v4088_v41, %v5570_v0 }
 0x6ca   :  { %4460 = vmatpush3.xpose.msra.mxu0 %v5582_v26  ;;  %v5608_v38 = vcombine.high %v5582_v26, %v5582_v26  ;;  %v5642_v49 = vmul.f32 %v4088_v41, %v5573_v23  ;;  %v5652_v52 = vmul.f32 %v4089_v16, %v5573_v23  ;;  %v5661_v54 = vmul.f32 %v4090_v43, %v5573_v23 }
 0x6cb   :  { %4469 = vmatprep.subr.mxu0 %v5186_v3  ;;  %v1032_v42 = vmul.f32 %v5585_v28, %v5597_v32  ;;  %v1034_v47 = vmul.f32 %v4088_v41, %v5597_v32  ;;  %v5649_v51 = vmul.f32 %v4088_v41, %v5613_v39  ;;  %v5655_v53 = vmul.f32 %v4089_v16, %v5613_v39 }
 0x6cc   :  { %4465 = vmatpush3.xpose.msra.mxu1 %v5608_v38  ;;  %v5664_v55 = vmul.f32 %v4090_v43, %v5613_v39  ;;  %v5667_v56 = vmul.f32 %v4091_v44, %v5573_v23  ;;  %v5671_v57 = vmul.f32 %v4091_v44, %v5613_v39  ;;  %v5674_v58 = vmul.f32 %v4092_v48, %v5573_v23 }
 0x6cd   :  { %4462 = vmatmul.mubr.f32.vlgmr.msra.gmra.mrb[4].mxu0 %v1031_v40  ;;  %4474 = vmatprep.subr.mxu1 %v5186_v3  ;;  %v5677_v30 = vmul.f32 %v4092_v48, %v5613_v39  ;;  %v5684_v59 = vmul.f32 %v5646_v50, %v5573_v23  ;;  %v5688_v60 = vmul.f32 %v5646_v50, %v5613_v39 }
 0x6ce   :  { %4470 = vmatpush3.xpose.msra.mxu0 %v5582_v26  ;;  %4471 = vmatprep.mubr.msk.f32.mxu0 %vm5185_vm0, %v5186_v3  ;;  %v5692_v61 = vmul.f32 %v5633_v45, %v5573_v23  ;;  %v1035_v29 = vmul.f32 %v4089_v16, %v5570_v0  ;;  %v5698_v62 = vmul.f32 %v5633_v45, %v5613_v39 }
 0x6cf   :  { %4467 = vmatmul.mubr.f32.vlgmr.msra.gmra.mrb[8].mxu1 %v1032_v42  ;;  %4479 = vmatprep.subr.mxu0 %v5186_v3  ;;  %v1036_v63 = vmul.f32 %v4089_v16, %v5597_v32  ;;  %v1037_v6 = vmul.f32 %v4090_v43, %v5570_v0  ;;  %v1038_v7 = vmul.f32 %v4090_v43, %v5597_v32 }
 0x6d0   :  { %4475 = vmatpush3.xpose.msra.mxu1 %v5608_v38  ;;  %4476 = vmatprep.mubr.msk.f32.mxu1 %vm5185_vm0, %v5186_v3  ;;  %v1039_v34 = vmul.f32 %v4091_v44, %v5570_v0  ;;  %v1040_v8 = vmul.f32 %v4091_v44, %v5597_v32  ;;  %v1041_v9 = vmul.f32 %v4092_v48, %v5570_v0 }
 0x6d1   :  { %4472 = vmatmul.mubr.f32.vlgmr.msra.gmra.mrb[6].mxu0 %v1033_v46  ;;  %4484 = vmatprep.subr.mxu1 %v5186_v3  ;;  %v1042_v33 = vmul.f32 %v4092_v48, %v5597_v32  ;;  %v1043_v35 = vmul.f32 %v5646_v50, %v5570_v0  ;;  %v1044_v11 = vmul.f32 %v5646_v50, %v5597_v32 }
 0x6d2   :  { %4480 = vmatpush3.xpose.msra.mxu0 %v5582_v26  ;;  %4481 = vmatprep.mubr.msk.f32.mxu0 %vm5185_vm0, %v5186_v3  ;;  %v1045_v12 = vmul.f32 %v5633_v45, %v5570_v0  ;;  %v1058_v14 = vmul.f32 %v5585_v28, %v5573_v23  ;;  %v1046_v15 = vmul.f32 %v5633_v45, %v5597_v32 }
 0x6d3   :  { %4477 = vmatmul.mubr.f32.vlgmr.msra.gmra.mrb[10].mxu1 %v1034_v47  ;;  %4489 = vmatprep.subr.mxu0 %v5186_v3  ;;  %v1059_v17 = vmul.f32 %v5585_v28, %v5613_v39 }
 0x6d4   :  { %4485 = vmatpush3.xpose.msra.mxu1 %v5608_v38  ;;  %4486 = vmatprep.mubr.msk.f32.mxu1 %vm5185_vm0, %v5186_v3 }
 0x6d5   :  { %4482 = vmatmul.mubr.f32.vlgmr.msra.gmra.mrb[8].mxu0 %v1035_v29  ;;  %4494 = vmatprep.subr.mxu1 %v5186_v3 }
 0x6d6   :  { %4490 = vmatpush3.xpose.msra.mxu0 %v5582_v26  ;;  %4491 = vmatprep.mubr.msk.f32.mxu0 %vm5185_vm0, %v5186_v3 }
 0x6d7   :  { %4487 = vmatmul.mubr.f32.vlgmr.msra.gmra.mrb[12].mxu1 %v1036_v63  ;;  %4499 = vmatprep.subr.mxu0 %v5186_v3 }
 0x6d8   :  { %4495 = vmatpush3.xpose.msra.mxu1 %v5608_v38  ;;  %4496 = vmatprep.mubr.msk.f32.mxu1 %vm5185_vm0, %v5186_v3 }
 0x6d9   :  { %4492 = vmatmul.mubr.f32.vlgmr.msra.gmra.mrb[10].mxu0 %v1037_v6  ;;  %4504 = vmatprep.subr.mxu1 %v5186_v3 }
 0x6da   :  { %4500 = vmatpush3.xpose.msra.mxu0 %v5582_v26  ;;  %4501 = vmatprep.mubr.msk.f32.mxu0 %vm5185_vm0, %v5186_v3 }
 0x6db   :  { %4497 = vmatmul.mubr.f32.vlgmr.msra.gmra.mrb[14].mxu1 %v1038_v7  ;;  %4509 = vmatprep.subr.mxu0 %v5186_v3 }
 0x6dc   :  { %4505 = vmatpush3.xpose.msra.mxu1 %v5608_v38  ;;  %4506 = vmatprep.mubr.msk.f32.mxu1 %vm5185_vm0, %v5186_v3 }
 0x6dd   :  { %4502 = vmatmul.mubr.f32.vlgmr.msra.gmra.mrb[12].mxu0 %v1039_v34  ;;  %4514 = vmatprep.subr.mxu1 %v5186_v3 }
 0x6de   :  { %4510 = vmatpush3.xpose.msra.mxu0 %v5582_v26  ;;  %4511 = vmatprep.mubr.msk.f32.mxu0 %vm5185_vm0, %v5186_v3 }
 0x6df   :  { %4507 = vmatmul.mubr.f32.vlgmr.msra.gmra.mrb[16].mxu1 %v1040_v8  ;;  %4519 = vmatprep.subr.mxu0 %v5186_v3 }
 0x6e0   :  { %4515 = vmatpush3.xpose.msra.mxu1 %v5608_v38  ;;  %4516 = vmatprep.mubr.msk.f32.mxu1 %vm5185_vm0, %v5186_v3 }
 0x6e1   :  { %4512 = vmatmul.mubr.f32.vlgmr.msra.gmra.mrb[14].mxu0 %v1041_v9  ;;  %4524 = vmatprep.subr.mxu1 %v5186_v3 }
 0x6e2   :  { %4520 = vmatpush3.xpose.msra.mxu0 %v5582_v26  ;;  %4521 = vmatprep.mubr.msk.f32.mxu0 %vm5185_vm0, %v5186_v3 }
 0x6e3   :  { %4517 = vmatmul.mubr.f32.vlgmr.msra.gmra.mrb[18].mxu1 %v1042_v33  ;;  %4529 = vmatprep.subr.mxu0 %v5186_v3 }
 0x6e4   :  { %4525 = vmatpush3.xpose.msra.mxu1 %v5608_v38  ;;  %4526 = vmatprep.mubr.msk.f32.mxu1 %vm5185_vm0, %v5186_v3 }
 0x6e5   :  { %4522 = vmatmul.mubr.f32.vlgmr.msra.gmra.mrb[16].mxu0 %v1043_v35  ;;  %4534 = vmatprep.subr.mxu1 %v5186_v3 }
 0x6e6   :  { %4530 = vmatpush3.xpose.msra.mxu0 %v5582_v26  ;;  %4531 = vmatprep.mubr.msk.f32.mxu0 %vm5185_vm0, %v5186_v3 }
 0x6e7   :  { %4527 = vmatmul.mubr.f32.vlgmr.msra.gmra.mrb[20].mxu1 %v1044_v11  ;;  %4539 = vmatprep.subr.mxu0 %v5186_v3 }
 0x6e8   :  { %4535 = vmatpush3.xpose.msra.mxu1 %v5608_v38  ;;  %4536 = vmatprep.mubr.msk.f32.mxu1 %vm5185_vm0, %v5186_v3 }
 0x6e9   :  { %4532 = vmatmul.mubr.f32.vlgmr.msra.gmra.mrb[18].mxu0 %v1045_v12  ;;  %4544 = vmatprep.subr.mxu1 %v5186_v3 }
 0x6ea   :  { %4540 = vmatpush3.msk.msra.mxu0 %vm717_vm9, %v1058_v14  ;;  %4541 = vmatprep.mubr.msk.f32.mxu0 %vm5185_vm0, %v5186_v3 }
 0x6eb   :  { %4537 = vmatmul.mubr.f32.vlgmr.msra.gmra.mrb[22].mxu1 %v1046_v15  ;;  %4549 = vmatprep.subr.mxu0 %v5186_v3 }
 0x6ec   :  { %4545 = vmatpush3.msk.msra.mxu1 %vm717_vm9, %v1059_v17  ;;  %4546 = vmatprep.mubr.msk.f32.mxu1 %vm5185_vm0, %v5186_v3 }
 0x6ed   :  { %4554 = vmatprep.subr.mxu1 %v5186_v3 }
 0x7a0   :  { %v1151_v18 = vpop.f32.mrb[4].mxu0 }
 0x7a1   :  { %v5771_v19 = vmul.f32 0.25, %v1151_v18  ;;  %v4463_v20 = vpop.f32.mrb[5].mxu0 }
 0x7a2   :  { %v1221_v2 = vpop.f32.mrb[8].mxu1 }
 0x7a3   :  { %v5773_v21 = vmul.f32 0.25, %v1221_v2  ;;  %v4468_v22 = vpop.f32.mrb[9].mxu1  ;;  %v2222_v0 = vsel %vm2221_vm2, %v5771_v19, -inf }
 0x7a4   :  { %2223 = vmax.xlane.f32.xlu1 %v2222_v0  ;;  %v1291_v23 = vpop.f32.mrb[6].mxu0 }
 0x7a5   :  { %v5777_v25 = vmul.f32 0.25, %v1291_v23  ;;  %v4473_v26 = vpop.f32.mrb[7].mxu0  ;;  %v2225_v28 = vsel %vm2221_vm2, %v5773_v21, -inf }
 0x7a6   :  { %2226 = vmax.xlane.f32.xlu0 %v2225_v28  ;;  %v1361_v31 = vpop.f32.mrb[10].mxu1 }
 0x7a7   :  { %v5781_v32 = vmul.f32 0.25, %v1361_v31  ;;  %v4478_v36 = vpop.f32.mrb[11].mxu1  ;;  %v2228_v38 = vsel %vm2221_vm2, %v5777_v25, -inf }
 0x7a8   :  { %2229 = vmax.xlane.f32.xlu1 %v2228_v38  ;;  %v1431_v39 = vpop.f32.mrb[8].mxu0 }
 0x7a9   :  { %v5785_v40 = vmul.f32 0.25, %v1431_v39  ;;  %v4483_v41 = vpop.f32.mrb[9].mxu0  ;;  %v2231_v16 = vsel %vm2221_vm2, %v5781_v32, -inf }
 0x7aa   :  { %2232 = vmax.xlane.f32.xlu0 %v2231_v16  ;;  %v1501_v42 = vpop.f32.mrb[12].mxu1 }
 0x7ab   :  { %v5789_v43 = vmul.f32 0.25, %v1501_v42  ;;  %v4488_v44 = vpop.f32.mrb[13].mxu1  ;;  %v2234_v45 = vsel %vm2221_vm2, %v5785_v40, -inf }
 0x7ac   :  { %2235 = vmax.xlane.f32.xlu1 %v2234_v45  ;;  %v1571_v46 = vpop.f32.mrb[10].mxu0 }
 0x7ad   :  { %v5793_v47 = vmul.f32 0.25, %v1571_v46  ;;  %v4493_v48 = vpop.f32.mrb[11].mxu0  ;;  %v2237_v50 = vsel %vm2221_vm2, %v5789_v43, -inf }
 0x7ae   :  { %2238 = vmax.xlane.f32.xlu0 %v2237_v50  ;;  %v1641_v29 = vpop.f32.mrb[14].mxu1 }
 0x7af   :  { %v5797_v63 = vmul.f32 0.25, %v1641_v29  ;;  %v4498_v6 = vpop.f32.mrb[15].mxu1  ;;  %v2240_v7 = vsel %vm2221_vm2, %v5793_v47, -inf }
 0x7b0   :  { %2241 = vmax.xlane.f32.xlu1 %v2240_v7  ;;  %v1711_v34 = vpop.f32.mrb[12].mxu0 }
 0x7b1   :  { %v5801_v8 = vmul.f32 0.25, %v1711_v34  ;;  %v4503_v9 = vpop.f32.mrb[13].mxu0  ;;  %v2243_v33 = vsel %vm2221_vm2, %v5797_v63, -inf }
 0x7b2   :  { %2244 = vmax.xlane.f32.xlu0 %v2243_v33  ;;  %v1781_v35 = vpop.f32.mrb[16].mxu1 }
 0x7b3   :  { %v5805_v11 = vmul.f32 0.25, %v1781_v35  ;;  %v4508_v12 = vpop.f32.mrb[17].mxu1  ;;  %v2246_v14 = vsel %vm2221_vm2, %v5801_v8, -inf }
 0x7b4   :  { %2247 = vmax.xlane.f32.xlu1 %v2246_v14  ;;  %v1851_v15 = vpop.f32.mrb[14].mxu0 }
 0x7b5   :  { %v5809_v17 = vmul.f32 0.25, %v1851_v15  ;;  %v4513_v18 = vpop.f32.mrb[15].mxu0  ;;  %v2249_v20 = vsel %vm2221_vm2, %v5805_v11, -inf }
 0x7b6   :  { %2250 = vmax.xlane.f32.xlu0 %v2249_v20  ;;  %v1921_v2 = vpop.f32.mrb[18].mxu1 }
 0x7b7   :  { %v5813_v22 = vmul.f32 0.25, %v1921_v2  ;;  %v4518_v0 = vpop.f32.mrb[19].mxu1  ;;  %v2252_v23 = vsel %vm2221_vm2, %v5809_v17, -inf }
 0x7b8   :  { %2253 = vmax.xlane.f32.xlu1 %v2252_v23  ;;  %v1991_v26 = vpop.f32.mrb[16].mxu0 }
 0x7b9   :  { %v5817_v28 = vmul.f32 0.25, %v1991_v26  ;;  %v4523_v31 = vpop.f32.mrb[17].mxu0  ;;  %v2255_v36 = vsel %vm2221_vm2, %v5813_v22, -inf }
 0x7ba   :  { %2256 = vmax.xlane.f32.xlu0 %v2255_v36  ;;  %v2061_v38 = vpop.f32.mrb[20].mxu1 }
 0x7bb   :  { %v5821_v39 = vmul.f32 0.25, %v2061_v38  ;;  %v4528_v41 = vpop.f32.mrb[21].mxu1  ;;  %v2258_v16 = vsel %vm2221_vm2, %v5817_v28, -inf }
 0x7bc   :  { %2259 = vmax.xlane.f32.xlu1 %v2258_v16  ;;  %v2131_v42 = vpop.f32.mrb[18].mxu0 }
 0x7bd   :  { %v5825_v44 = vmul.f32 0.25, %v2131_v42  ;;  %v4533_v45 = vpop.f32.mrb[19].mxu0  ;;  %v2261_v46 = vsel %vm2221_vm2, %v5821_v39, -inf }
 0x7be   :  { %2262 = vmax.xlane.f32.xlu0 %v2261_v46  ;;  %v2201_v48 = vpop.f32.mrb[22].mxu1 }
 0x7bf   :  { %v5829_v50 = vmul.f32 0.25, %v2201_v48  ;;  %v4538_v29 = vpop.f32.mrb[23].mxu1  ;;  %v2264_v6 = vsel %vm2221_vm2, %v5825_v44, -inf }
 0x7c0   :  { %2265 = vmax.xlane.f32.xlu1 %v2264_v6 }
 0x7c1   :  { %v2267_v7 = vsel %vm2221_vm2, %v5829_v50, -inf }
 0x7c2   :  { %2268 = vmax.xlane.f32.xlu0 %v2267_v7 }
 0x831   :  { %v2224_v34 = vpop.xlane.xlu1 %2223 }
 0x832   :  { %v2270_v9 = vsub.f32 %v5771_v19, %v2224_v34 }
 0x833   :  { %v2227_v33 = vpop.xlane.xlu0 %2226 }
 0x834   :  { %v2286_v35 = vmul.f32 1.442695, %v2270_v9  ;;  %v2271_v12 = vsub.f32 %v5773_v21, %v2227_v33 }
 0x835   :  { %v2230_v14 = vpop.xlane.xlu1 %2229 }
 0x836   :  { %4965 = vpow2.f32 %v2286_v35  ;;  %v2288_v15 = vmul.f32 1.442695, %v2271_v12  ;;  %v2272_v18 = vsub.f32 %v5777_v25, %v2230_v14 }
 0x837   :  { %v2233_v20 = vpop.xlane.xlu0 %2232 }
 0x838   :  { %4967 = vpow2.f32 %v2288_v15  ;;  %v2290_v2 = vmul.f32 1.442695, %v2272_v18  ;;  %v2273_v0 = vsub.f32 %v5781_v32, %v2233_v20 }
 0x839   :  { %v2236_v23 = vpop.xlane.xlu1 %2235 }
 0x83a   :  { %4969 = vpow2.f32 %v2290_v2  ;;  %v2292_v26 = vmul.f32 1.442695, %v2273_v0  ;;  %v2274_v31 = vsub.f32 %v5785_v40, %v2236_v23 }
 0x83b   :  { %v2239_v19 = vpop.xlane.xlu0 %2238 }
 0x83c   :  { %4971 = vpow2.f32 %v2292_v26  ;;  %v2294_v36 = vmul.f32 1.442695, %v2274_v31  ;;  %v2275_v21 = vsub.f32 %v5789_v43, %v2239_v19 }
 0x83d   :  { %v2242_v38 = vpop.xlane.xlu1 %2241 }
 0x83e   :  { %4973 = vpow2.f32 %v2294_v36  ;;  %v2296_v41 = vmul.f32 1.442695, %v2275_v21  ;;  %v2276_v25 = vsub.f32 %v5793_v47, %v2242_v38 }
 0x83f   :  { %v2245_v16 = vpop.xlane.xlu0 %2244 }
 0x840   :  { %v5842_v42 = vpop.eup %4965  ;;  %4975 = vpow2.f32 %v2296_v41  ;;  %v2298_v32 = vmul.f32 1.442695, %v2276_v25  ;;  %v2277_v45 = vsub.f32 %v5797_v63, %v2245_v16 }
 0x841   :  { %v2248_v46 = vpop.xlane.xlu1 %2247  ;;  %v2318_v40 = vsel %vm2221_vm2, %v5842_v42, 0.0 }
 0x842   :  { %v5847_v48 = vpop.eup %4967  ;;  %4977 = vpow2.f32 %v2298_v32  ;;  %v2300_v43 = vmul.f32 1.442695, %v2277_v45  ;;  %v2278_v29 = vsub.f32 %v5801_v8, %v2248_v46  ;;  %2319 = vadd.xlane.f32.xlu1 %v2318_v40 }
 0x843   :  { %v2251_v6 = vpop.xlane.xlu0 %2250  ;;  %v2321_v47 = vsel %vm2221_vm2, %v5847_v48, 0.0 }
 0x844   :  { %v5852_v7 = vpop.eup %4969  ;;  %4979 = vpow2.f32 %v2300_v43  ;;  %v2302_v34 = vmul.f32 1.442695, %v2278_v29  ;;  %v2279_v63 = vsub.f32 %v5805_v11, %v2251_v6  ;;  %2322 = vadd.xlane.f32.xlu0 %v2321_v47 }
 0x845   :  { %v2254_v9 = vpop.xlane.xlu1 %2253  ;;  %v2324_v33 = vsel %vm2221_vm2, %v5852_v7, 0.0 }
 0x846   :  { %v5857_v35 = vpop.eup %4971  ;;  %4981 = vpow2.f32 %v2302_v34  ;;  %v2304_v8 = vmul.f32 1.442695, %v2279_v63  ;;  %v2280_v12 = vsub.f32 %v5809_v17, %v2254_v9  ;;  %2325 = vadd.xlane.f32.xlu1 %v2324_v33 }
 0x847   :  { %v2257_v14 = vpop.xlane.xlu0 %2256  ;;  %v2327_v15 = vsel %vm2221_vm2, %v5857_v35, 0.0 }
 0x848   :  { %v5862_v18 = vpop.eup %4973  ;;  %4983 = vpow2.f32 %v2304_v8  ;;  %v2306_v11 = vmul.f32 1.442695, %v2280_v12  ;;  %v2281_v20 = vsub.f32 %v5813_v22, %v2257_v14  ;;  %2328 = vadd.xlane.f32.xlu0 %v2327_v15 }
 0x849   :  { %v2260_v2 = vpop.xlane.xlu1 %2259  ;;  %v2330_v0 = vsel %vm2221_vm2, %v5862_v18, 0.0 }
 0x84a   :  { %v5867_v23 = vpop.eup %4975  ;;  %4985 = vpow2.f32 %v2306_v11  ;;  %v2308_v17 = vmul.f32 1.442695, %v2281_v20  ;;  %v2282_v26 = vsub.f32 %v5817_v28, %v2260_v2  ;;  %2331 = vadd.xlane.f32.xlu1 %v2330_v0 }
 0x84b   :  { %v2263_v31 = vpop.xlane.xlu0 %2262  ;;  %v2333_v19 = vsel %vm2221_vm2, %v5867_v23, 0.0 }
 0x84c   :  { %v5872_v36 = vpop.eup %4977  ;;  %4987 = vpow2.f32 %v2308_v17  ;;  %v2310_v22 = vmul.f32 1.442695, %v2282_v26  ;;  %v2283_v21 = vsub.f32 %v5821_v39, %v2263_v31  ;;  %2334 = vadd.xlane.f32.xlu0 %v2333_v19 }
 0x84d   :  { %v2266_v38 = vpop.xlane.xlu1 %2265  ;;  %v2336_v41 = vsel %vm2221_vm2, %v5872_v36, 0.0 }
 0x84e   :  { %v5877_v25 = vpop.eup %4979  ;;  %4989 = vpow2.f32 %v2310_v22  ;;  %v2312_v28 = vmul.f32 1.442695, %v2283_v21  ;;  %v2284_v16 = vsub.f32 %v5825_v44, %v2266_v38  ;;  %2337 = vadd.xlane.f32.xlu1 %v2336_v41 }
 0x84f   :  { %v2269_v32 = vpop.xlane.xlu0 %2268  ;;  %v2339_v45 = vsel %vm2221_vm2, %v5877_v25, 0.0 }
 0x850   :  { %v5882_v46 = vpop.eup %4981  ;;  %4991 = vpow2.f32 %v2312_v28  ;;  %v2314_v39 = vmul.f32 1.442695, %v2284_v16  ;;  %v2285_v40 = vsub.f32 %v5829_v50, %v2269_v32  ;;  %2340 = vadd.xlane.f32.xlu0 %v2339_v45 }
 0x851   :  { %v2342_v43 = vsel %vm2221_vm2, %v5882_v46, 0.0 }
 0x852   :  { %v5887_v29 = vpop.eup %4983  ;;  %4993 = vpow2.f32 %v2314_v39  ;;  %v2316_v6 = vmul.f32 1.442695, %v2285_v40  ;;  %2343 = vadd.xlane.f32.xlu1 %v2342_v43 }
 0x853   :  { %v2345_v44 = vsel %vm2221_vm2, %v5887_v29, 0.0 }
 0x854   :  { %v5891_v47 = vpop.eup %4985  ;;  %4995 = vpow2.f32 %v2316_v6  ;;  %2346 = vadd.xlane.f32.xlu0 %v2345_v44 }
 0x855   :  { %v2348_v34 = vsel %vm2221_vm2, %v5891_v47, 0.0 }
 0x856   :  { %v5895_v50 = vpop.eup %4987  ;;  %2349 = vadd.xlane.f32.xlu1 %v2348_v34 }
 0x857   :  { %v2351_v63 = vsel %vm2221_vm2, %v5895_v50, 0.0 }
 0x858   :  { %v5899_v9 = vpop.eup %4989  ;;  %2352 = vadd.xlane.f32.xlu0 %v2351_v63 }
 0x859   :  { %v2354_v33 = vsel %vm2221_vm2, %v5899_v9, 0.0 }
 0x85a   :  { %v5903_v8 = vpop.eup %4991  ;;  %2355 = vadd.xlane.f32.xlu1 %v2354_v33 }
 0x85b   :  { %v2357_v12 = vsel %vm2221_vm2, %v5903_v8, 0.0 }
 0x85c   :  { %v5907_v14 = vpop.eup %4993  ;;  %2358 = vadd.xlane.f32.xlu0 %v2357_v12  ;;  %v3646_v12 = vld [vmem:[#allocation7 + $0x8] sm:$0xff] }
 0x85d   :  { %v2360_v15 = vsel %vm2221_vm2, %v5907_v14, 0.0 }
 0x85e   :  { %v5911_v11 = vpop.eup %4995  ;;  %2361 = vadd.xlane.f32.xlu1 %v2360_v15  ;;  %v3648_v15 = vld [vmem:[#allocation7 + $0x18] sm:$0xff] }
 0x85f   :  { %v2363_v20 = vsel %vm2221_vm2, %v5911_v11, 0.0 }
 0x860   :  { %2364 = vadd.xlane.f32.xlu0 %v2363_v20  ;;  %v3649_v20 = vld [vmem:[#allocation7 + $0x20] sm:$0xff] }
 0x8cf   :  { %v2320_v2 = vpop.xlane.xlu1 %2319 }
 0x8d0   :  { %4997 = vrcp.f32 %v2320_v2  ;;  %v3650_v2 = vld [vmem:[#allocation7 + $0x28] sm:$0xff] }
 0x8d1   :  { %v2323_v0 = vpop.xlane.xlu0 %2322 }
 0x8d2   :  { %4999 = vrcp.f32 %v2323_v0  ;;  %v4867_v0 = vpack.c.bf16 %v3650_v2, %v3649_v20 }
 0x8d3   :  { %v2326_v17 = vpop.xlane.xlu1 %2325 }
 0x8d4   :  { %5001 = vrcp.f32 %v2326_v17  ;;  %v3651_v17 = vld [vmem:[#allocation7 + $0x30] sm:$0xff] }
 0x8d5   :  { %v2329_v26 = vpop.xlane.xlu0 %2328 }
 0x8d6   :  { %5003 = vrcp.f32 %v2329_v26  ;;  %v3652_v26 = vld [vmem:[#allocation7 + $0x38] sm:$0xff] }
 0x8d7   :  { %v2332_v31 = vpop.xlane.xlu1 %2331 }
 0x8d8   :  { %5005 = vrcp.f32 %v2332_v31  ;;  %v4870_v31 = vpack.c.bf16 %v3652_v26, %v3651_v17 }
 0x8d9   :  { %v2335_v19 = vpop.xlane.xlu0 %2334 }
 0x8da   :  { %v4998_v22 = vpop.eup %4997  ;;  %5007 = vrcp.f32 %v2335_v19  ;;  %v3653_v19 = vld [vmem:[#allocation7 + $0x40] sm:$0xff] }
 0x8db   :  { %v2382_v21 = vmul.f32 %v4998_v22, %v5842_v42  ;;  %v2338_v38 = vpop.xlane.xlu1 %2337  ;;  %v3654_v22 = vld [vmem:[#allocation7 + $0x48] sm:$0xff] }
 0x8dc   :  { %v5000_v41 = vpop.eup %4999  ;;  %5009 = vrcp.f32 %v2338_v38  ;;  %v3655_v38 = vld [vmem:[#allocation7 + $0x50] sm:$0xff] }
 0x8dd   :  { %v2383_v28 = vmul.f32 %v5000_v41, %v5847_v48  ;;  %4542 = vmatmul.mubr.msk.f32.vlgmr.msra.gmra.mrb[20].mxu0 %vm2398_vm3, %v2382_v21  ;;  %v2341_v16 = vpop.xlane.xlu0 %2340  ;;  %v4873_v21 = vpack.c.bf16 %v3654_v22, %v3653_v19  ;;  %v3656_v41 = vld [vmem:[#allocation7 + $0x58] sm:$0xff] }
 0x8de   :  { %v5002_v32 = vpop.eup %5001  ;;  %4550 = vmatpush3.msk.msra.mxu0 %vm717_vm9, %v5642_v49  ;;  %5011 = vrcp.f32 %v2341_v16  ;;  %4551 = vmatprep.mubr.msk.f32.mxu0 %vm5185_vm0, %v5186_v3  ;;  %v3657_v16 = vld [vmem:[#allocation7 + $0x60] sm:$0xff] }
 0x8df   :  { %v2384_v45 = vmul.f32 %v5002_v32, %v5852_v7  ;;  %v2344_v39 = vpop.xlane.xlu1 %2343  ;;  %4547 = vmatmul.mubr.msk.f32.vlgmr.msra.gmra.mrb[24].mxu1 %vm2398_vm3, %v2383_v28  ;;  %4559 = vmatprep.subr.mxu0 %v5186_v3  ;;  %v4876_v28 = vpack.c.bf16 %v3656_v41, %v3655_v38  ;;  %v3658_v32 = vld [vmem:[#allocation7 + $0x68] sm:$0xff] }
 0x8e0   :  { %v5004_v42 = vpop.eup %5003  ;;  %5013 = vrcp.f32 %v2344_v39  ;;  %4555 = vmatpush3.msk.msra.mxu1 %vm717_vm9, %v5649_v51  ;;  %4556 = vmatprep.mubr.msk.f32.mxu1 %vm5185_vm0, %v5186_v3  ;;  %v4879_v39 = vpack.c.bf16 %v3658_v32, %v3657_v16 }
 0x8e1   :  { %v2385_v49 = vmul.f32 %v5004_v42, %v5857_v35  ;;  %4552 = vmatmul.mubr.msk.f32.vlgmr.msra.gmra.mrb[22].mxu0 %vm2398_vm3, %v2384_v45  ;;  %v2347_v48 = vpop.xlane.xlu0 %2346  ;;  %4564 = vmatprep.subr.mxu1 %v5186_v3  ;;  %v3659_v45 = vld [vmem:[#allocation7 + $0x70] sm:$0xff]  ;;  %v3660_v42 = vld [vmem:[#allocation7 + $0x78] sm:$0xff] }
 0x8e2   :  { %v5006_v7 = vpop.eup %5005  ;;  %4560 = vmatpush3.msk.msra.mxu0 %vm717_vm9, %v5652_v52  ;;  %5015 = vrcp.f32 %v2347_v48  ;;  %4561 = vmatprep.mubr.msk.f32.mxu0 %vm5185_vm0, %v5186_v3 }
 0x8e3   :  { %v2386_v51 = vmul.f32 %v5006_v7, %v5862_v18  ;;  %v2350_v40 = vpop.xlane.xlu1 %2349  ;;  %4557 = vmatmul.mubr.msk.f32.vlgmr.msra.gmra.mrb[26].mxu1 %vm2398_vm3, %v2385_v49  ;;  %4569 = vmatprep.subr.mxu0 %v5186_v3  ;;  %v4882_v49 = vpack.c.bf16 %v3660_v42, %v3659_v45 }
 0x8e4   :  { %v5008_v35 = vpop.eup %5007  ;;  %5017 = vrcp.f32 %v2350_v40  ;;  %4565 = vmatpush3.msk.msra.mxu1 %vm717_vm9, %v5655_v53  ;;  %4566 = vmatprep.mubr.msk.f32.mxu1 %vm5185_vm0, %v5186_v3 }
 0x8e5   :  { %v2387_v52 = vmul.f32 %v5008_v35, %v5867_v23  ;;  %4562 = vmatmul.mubr.msk.f32.vlgmr.msra.gmra.mrb[24].mxu0 %vm2398_vm3, %v2386_v51  ;;  %v2353_v43 = vpop.xlane.xlu0 %2352  ;;  %4574 = vmatprep.subr.mxu1 %v5186_v3 }
 0x8e6   :  { %v5010_v18 = vpop.eup %5009  ;;  %4570 = vmatpush3.msk.msra.mxu0 %vm717_vm9, %v5661_v54  ;;  %5019 = vrcp.f32 %v2353_v43  ;;  %4571 = vmatprep.mubr.msk.f32.mxu0 %vm5185_vm0, %v5186_v3 }
 0x8e7   :  { %v2388_v53 = vmul.f32 %v5010_v18, %v5872_v36  ;;  %v2356_v6 = vpop.xlane.xlu1 %2355  ;;  %4567 = vmatmul.mubr.msk.f32.vlgmr.msra.gmra.mrb[28].mxu1 %vm2398_vm3, %v2387_v52  ;;  %4579 = vmatprep.subr.mxu0 %v5186_v3 }
 0x8e8   :  { %v5012_v23 = vpop.eup %5011  ;;  %5021 = vrcp.f32 %v2356_v6  ;;  %4575 = vmatpush3.msk.msra.mxu1 %vm717_vm9, %v5664_v55  ;;  %4576 = vmatprep.mubr.msk.f32.mxu1 %vm5185_vm0, %v5186_v3 }
 0x8e9   :  { %v2389_v54 = vmul.f32 %v5012_v23, %v5877_v25  ;;  %4572 = vmatmul.mubr.msk.f32.vlgmr.msra.gmra.mrb[26].mxu0 %vm2398_vm3, %v2388_v53  ;;  %v2359_v44 = vpop.xlane.xlu0 %2358  ;;  %4584 = vmatprep.subr.mxu1 %v5186_v3 }
 0x8ea   :  { %v5014_v36 = vpop.eup %5013  ;;  %4580 = vmatpush3.msk.msra.mxu0 %vm717_vm9, %v5667_v56  ;;  %5023 = vrcp.f32 %v2359_v44  ;;  %4581 = vmatprep.mubr.msk.f32.mxu0 %vm5185_vm0, %v5186_v3 }
 0x8eb   :  { %v2390_v55 = vmul.f32 %v5014_v36, %v5882_v46  ;;  %v2362_v34 = vpop.xlane.xlu1 %2361  ;;  %4577 = vmatmul.mubr.msk.f32.vlgmr.msra.gmra.mrb[30].mxu1 %vm2398_vm3, %v2389_v54  ;;  %4589 = vmatprep.subr.mxu0 %v5186_v3 }
 0x8ec   :  { %v5016_v25 = vpop.eup %5015  ;;  %5025 = vrcp.f32 %v2362_v34  ;;  %4585 = vmatpush3.msk.msra.mxu1 %vm717_vm9, %v5671_v57  ;;  %4586 = vmatprep.mubr.msk.f32.mxu1 %vm5185_vm0, %v5186_v3 }
 0x8ed   :  { %v2391_v56 = vmul.f32 %v5016_v25, %v5887_v29  ;;  %4582 = vmatmul.mubr.msk.f32.vlgmr.msra.gmra.mrb[28].mxu0 %vm2398_vm3, %v2390_v55  ;;  %v2365_v63 = vpop.xlane.xlu0 %2364  ;;  %4594 = vmatprep.subr.mxu1 %v5186_v3 }
 0x8ee   :  { %v5018_v46 = vpop.eup %5017  ;;  %4590 = vmatpush3.msk.msra.mxu0 %vm717_vm9, %v5674_v58  ;;  %5027 = vrcp.f32 %v2365_v63  ;;  %4591 = vmatprep.mubr.msk.f32.mxu0 %vm5185_vm0, %v5186_v3 }
 0x8ef   :  { %v2392_v57 = vmul.f32 %v5018_v46, %v5891_v47  ;;  %4587 = vmatmul.mubr.msk.f32.vlgmr.msra.gmra.mrb[32].mxu1 %vm2398_vm3, %v2391_v56  ;;  %4599 = vmatprep.subr.mxu0 %v5186_v3 }
 0x8f0   :  { %v5020_v29 = vpop.eup %5019  ;;  %4595 = vmatpush3.msk.msra.mxu1 %vm717_vm9, %v5677_v30  ;;  %4596 = vmatprep.mubr.msk.f32.mxu1 %vm5185_vm0, %v5186_v3 }
 0x8f1   :  { %v2393_v33 = vmul.f32 %v5020_v29, %v5895_v50  ;;  %4592 = vmatmul.mubr.msk.f32.vlgmr.msra.gmra.mrb[30].mxu0 %vm2398_vm3, %v2392_v57  ;;  %4604 = vmatprep.subr.mxu1 %v5186_v3 }
 0x8f2   :  { %v5022_v58 = vpop.eup %5021  ;;  %4600 = vmatpush3.msk.msra.mxu0 %vm717_vm9, %v5684_v59  ;;  %4601 = vmatprep.mubr.msk.f32.mxu0 %vm5185_vm0, %v5186_v3 }
 0x8f3   :  { %v2394_v47 = vmul.f32 %v5022_v58, %v5899_v9  ;;  %4597 = vmatmul.mubr.msk.f32.vlgmr.msra.gmra.mrb[34].mxu1 %vm2398_vm3, %v2393_v33  ;;  %4609 = vmatprep.subr.mxu0 %v5186_v3 }
 0x8f4   :  { %v5024_v30 = vpop.eup %5023  ;;  %4605 = vmatpush3.msk.msra.mxu1 %vm717_vm9, %v5688_v60  ;;  %4606 = vmatprep.mubr.msk.f32.mxu1 %vm5185_vm0, %v5186_v3 }
 0x8f5   :  { %v2395_v50 = vmul.f32 %v5024_v30, %v5903_v8  ;;  %4602 = vmatmul.mubr.msk.f32.vlgmr.msra.gmra.mrb[32].mxu0 %vm2398_vm3, %v2394_v47  ;;  %4614 = vmatprep.subr.mxu1 %v5186_v3 }
 0x8f6   :  { %v5026_v59 = vpop.eup %5025  ;;  %4610 = vmatpush3.msk.msra.mxu0 %vm717_vm9, %v5692_v61  ;;  %4611 = vmatprep.mubr.msk.f32.mxu0 %vm5185_vm0, %v5186_v3  ;;  %v3645_v61 = vld [vmem:[#allocation7] sm:$0xff] }
 0x8f7   :  { %v2396_v9 = vmul.f32 %v5026_v59, %v5907_v14  ;;  %4607 = vmatmul.mubr.msk.f32.vlgmr.msra.gmra.mrb[36].mxu1 %vm2398_vm3, %v2395_v50  ;;  %4860 = vmatprep.subr.bf16.mxu0 %v5184_v1  ;;  %v3647_v14 = vld [vmem:[#allocation7 + $0x10] sm:$0xff] }
 0x8f8   :  { %v5028_v60 = vpop.eup %5027  ;;  %4615 = vmatpush3.msk.msra.mxu1 %vm717_vm9, %v5698_v62  ;;  %4616 = vmatprep.mubr.msk.f32.mxu1 %vm5185_vm0, %v5186_v3  ;;  %v4861_v62 = vpack.c.bf16 %v3646_v12, %v3645_v61 }
 0x8f9   :  { %v2397_v8 = vmul.f32 %v5028_v60, %v5911_v11  ;;  %4612 = vmatmul.mubr.msk.f32.vlgmr.msra.gmra.mrb[34].mxu0 %vm2398_vm3, %v2396_v9  ;;  %4884 = vmatprep.subr.bf16.mxu1 %v5184_v1  ;;  %v4864_v11 = vpack.c.bf16 %v3648_v15, %v3647_v14 }
 0x8fa   :  { %4651 = vmatprep.mubr.msk.f32.mxu0 %vm5185_vm0, %v5186_v3  ;;  %4862 = vmatpush3.bf16.msra.mxu0 %v4861_v62 }
 0x8fb   :  { %4617 = vmatmul.mubr.msk.f32.vlgmr.msra.gmra.mrb[38].mxu1 %vm2398_vm3, %v2397_v8  ;;  %4863 = vmatprep.subr.bf16.mxu0 %v5184_v1 }
 0x8fc   :  { %4686 = vmatprep.mubr.msk.f32.mxu1 %vm5185_vm0, %v5186_v3 }
 0x8fe   :  { %4865 = vmatpush3.bf16.msra.mxu0 %v4864_v11 }
 0x8ff   :  { %4866 = vmatprep.subr.bf16.mxu0 %v5184_v1 }
 0x902   :  { %4868 = vmatpush3.bf16.msra.mxu0 %v4867_v0 }
 0x903   :  { %4869 = vmatprep.subr.bf16.mxu0 %v5184_v1 }
 0x906   :  { %4871 = vmatpush3.bf16.msra.mxu0 %v4870_v31 }
 0x907   :  { %4872 = vmatprep.subr.bf16.mxu0 %v5184_v1 }
 0x90a   :  { %4874 = vmatpush3.bf16.msra.mxu0 %v4873_v21 }
 0x90b   :  { %4875 = vmatprep.subr.bf16.mxu0 %v5184_v1 }
 0x90e   :  { %4877 = vmatpush3.bf16.msra.mxu0 %v4876_v28 }
 0x90f   :  { %4878 = vmatprep.subr.bf16.mxu0 %v5184_v1 }
 0x912   :  { %4880 = vmatpush3.bf16.msra.mxu0 %v4879_v39 }
 0x913   :  { %4881 = vmatprep.subr.bf16.mxu0 %v5184_v1 }
 0x916   :  { %4883 = vmatpush3.bf16.msra.mxu0 %v4882_v49 }
 0x917   :  { %4908 = vmatprep.subr.bf16.mxu0 %v5184_v1 }
 0x9b0   :  { %v2471_v48 = vpop.f32.mrb[20].mxu0 }
 0x9b1   :  { %v4543_v7 = vpop.f32.mrb[21].mxu0  ;;  %v3615_v52 = vsel %vm717_vm9, %v2471_v48, 0.0 }
 0x9b2   :  { %v2547_v51 = vpop.f32.mrb[24].mxu1 }
 0x9b3   :  { %v4548_v40 = vpop.f32.mrb[25].mxu1  ;;  %v3630_v23 = vsel %vm717_vm9, %v2547_v51, 0.0 }
 0x9b4   :  { %v2623_v35 = vpop.f32.mrb[22].mxu0 }
 0x9b5   :  { %v3616_v43 = vsel %vm717_vm9, %v2623_v35, 0.0  ;;  %v4553_v18 = vpop.f32.mrb[23].mxu0 }
 0x9b6   :  { %v3617_v53 = vadd.f32 %v3616_v43, %v3615_v52  ;;  %v2699_v6 = vpop.f32.mrb[26].mxu1 }
 0x9b7   :  { %v3631_v54 = vsel %vm717_vm9, %v2699_v6, 0.0  ;;  %v4558_v44 = vpop.f32.mrb[27].mxu1  ;;  %v4127_v6 = vld [vmem:[%s6171_s10] ss:$0 sm:$0xff] }
 0x9b8   :  { %v3632_v36 = vadd.f32 %v3631_v54, %v3630_v23  ;;  %v2775_v55 = vpop.f32.mrb[24].mxu0 }
 0x9b9   :  { %v3618_v34 = vsel %vm717_vm9, %v2775_v55, 0.0  ;;  %v4563_v25 = vpop.f32.mrb[25].mxu0  ;;  %v3765_v55 = vrot.slane %v5464_v24, %v5362_v4 }
 0x9ba   :  { %v3619_v56 = vadd.f32 %v3618_v34, %v3617_v53  ;;  %v2851_v63 = vpop.f32.mrb[28].mxu1 }
 0x9bb   :  { %v3633_v46 = vsel %vm717_vm9, %v2851_v63, 0.0  ;;  %v4568_v57 = vpop.f32.mrb[29].mxu1 }
 0x9bc   :  { %v3634_v29 = vadd.f32 %v3633_v46, %v3632_v36  ;;  %v2927_v33 = vpop.f32.mrb[26].mxu0 }
 0x9bd   :  { %v3620_v58 = vsel %vm717_vm9, %v2927_v33, 0.0  ;;  %v4573_v47 = vpop.f32.mrb[27].mxu0 }
 0x9be   :  { %v3621_v30 = vadd.f32 %v3620_v58, %v3619_v56  ;;  %v3003_v50 = vpop.f32.mrb[30].mxu1 }
 0x9bf   :  { %v3635_v59 = vsel %vm717_vm9, %v3003_v50, 0.0  ;;  %v4578_v9 = vpop.f32.mrb[31].mxu1 }
 0x9c0   :  { %v3636_v60 = vadd.f32 %v3635_v59, %v3634_v29  ;;  %v3079_v8 = vpop.f32.mrb[28].mxu0 }
 0x9c1   :  { %v3622_v61 = vsel %vm717_vm9, %v3079_v8, 0.0  ;;  %v4583_v12 = vpop.f32.mrb[29].mxu0 }
 0x9c2   :  { %v3623_v62 = vadd.f32 %v3622_v61, %v3621_v30  ;;  %v3155_v14 = vpop.f32.mrb[32].mxu1 }
 0x9c3   :  { %v3637_v15 = vsel %vm717_vm9, %v3155_v14, 0.0  ;;  %v4588_v11 = vpop.f32.mrb[33].mxu1 }
 0x9c4   :  { %v3638_v20 = vadd.f32 %v3637_v15, %v3636_v60  ;;  %v3231_v2 = vpop.f32.mrb[30].mxu0 }
 0x9c5   :  { %v3624_v0 = vsel %vm717_vm9, %v3231_v2, 0.0  ;;  %v4593_v17 = vpop.f32.mrb[31].mxu0  ;;  %v3867_v2 = vld [vmem:[#allocation10] sm:$0xff] }
 0x9c6   :  { %v3625_v26 = vadd.f32 %v3624_v0, %v3623_v62  ;;  %v3307_v31 = vpop.f32.mrb[34].mxu1  ;;  %v3868_v0 = vld [vmem:[#allocation10 + $0x8] sm:$0xff]  ;;  %v3869_v17 = vld [vmem:[#allocation10 + $0x10] sm:$0xff] }
 0x9c7   :  { %v3639_v19 = vsel %vm717_vm9, %v3307_v31, 0.0  ;;  %v4598_v22 = vpop.f32.mrb[35].mxu1  ;;  %v3870_v31 = vld [vmem:[#allocation10 + $0x18] sm:$0xff] }
 0x9c8   :  { %v3640_v21 = vadd.f32 %v3639_v19, %v3638_v20  ;;  %v3383_v38 = vpop.f32.mrb[32].mxu0  ;;  %v4888_v19 = vpack.c.bf16 %v3870_v31, %v3869_v17  ;;  %v3871_v22 = vld [vmem:[#allocation10 + $0x20] sm:$0xff] }
 0x9c9   :  { %v3626_v41 = vsel %vm717_vm9, %v3383_v38, 0.0  ;;  %v4603_v28 = vpop.f32.mrb[33].mxu0 }
 0x9ca   :  { %v3627_v16 = vadd.f32 %v3626_v41, %v3625_v26  ;;  %v3459_v32 = vpop.f32.mrb[36].mxu1  ;;  %v4885_v26 = vpack.c.bf16 %v3868_v0, %v3867_v2 }
 0x9cb   :  { %v3641_v45 = vsel %vm717_vm9, %v3459_v32, 0.0  ;;  %v4608_v39 = vpop.f32.mrb[37].mxu1 }
 0x9cc   :  { %v3642_v42 = vadd.f32 %v3641_v45, %v3640_v21  ;;  %v3535_v49 = vpop.f32.mrb[34].mxu0  ;;  %4886 = vmatpush3.bf16.msra.mxu1 %v4885_v26  ;;  %v3872_v21 = vld [vmem:[#allocation10 + $0x28] sm:$0xff]  ;;  %v3873_v39 = vld [vmem:[#allocation10 + $0x30] sm:$0xff] }
 0x9cd   :  { %v3628_v48 = vsel %vm717_vm9, %v3535_v49, 0.0  ;;  %v4613_v7 = vpop.f32.mrb[35].mxu0  ;;  %4887 = vmatprep.subr.bf16.mxu1 %v5184_v1  ;;  %v4891_v38 = vpack.c.bf16 %v3872_v21, %v3871_v22  ;;  %v3980_v21 = vld [vmem:[%s6176_s15 + $0x78] sm:$0xff] }
 0x9ce   :  { %v3629_v51 = vadd.f32 %v3628_v48, %v3627_v16  ;;  %v3611_v40 = vpop.f32.mrb[38].mxu1  ;;  %v3875_v48 = vld [vmem:[#allocation10 + $0x40] sm:$0xff]  ;;  %v3876_v7 = vld [vmem:[#allocation10 + $0x48] sm:$0xff] }
 0x9cf   :  { %v3643_v35 = vsel %vm717_vm9, %v3611_v40, 0.0  ;;  %v4618_v52 = vpop.f32.mrb[39].mxu1  ;;  %v3877_v40 = vld [vmem:[#allocation10 + $0x50] sm:$0xff] }
 0x9d0   :  { %v3644_v43 = vadd.f32 %v3643_v35, %v3642_v42  ;;  %4889 = vmatpush3.bf16.msra.mxu1 %v4888_v19  ;;  %v3874_v42 = vld [vmem:[#allocation10 + $0x38] sm:$0xff]  ;;  %v3880_v52 = vld [vmem:[#allocation10 + $0x68] sm:$0xff] }
 0x9d1   :  { %4890 = vmatprep.subr.bf16.mxu1 %v5184_v1  ;;  %v4894_v49 = vpack.c.bf16 %v3874_v42, %v3873_v39 }
 0x9d2   :  { %v3670_v18 = vcombine.low %v3629_v51, %v3644_v43  ;;  %v4897_v51 = vpack.c.bf16 %v3876_v7, %v3875_v48 }
 0x9d4   :  { %v3677_v53 = vrot.slane %v3670_v18, %v5549_v27  ;;  %4892 = vmatpush3.bf16.msra.mxu1 %v4891_v38  ;;  %v3881_v18 = vld [vmem:[#allocation10 + $0x70] sm:$0xff] }
 0x9d5   :  { %4893 = vmatprep.subr.bf16.mxu1 %v5184_v1 }
 0x9d6   :  { %4652 = vmatmul.mubr.f32.vlgmr.msra.gmra.mrb[36].mxu0 %v3677_v53  ;;  %v3882_v53 = vld [vmem:[#allocation10 + $0x78] sm:$0xff] }
 0x9d7   :  { %4721 = vmatprep.mubr.msk.f32.mxu0 %vm5185_vm0, %v5186_v3  ;;  %vm4058_vm0 = vcmask 17408  }
 0x9d8   :  { %4895 = vmatpush3.bf16.msra.mxu1 %v4894_v49 }
 0x9d9   :  { %4896 = vmatprep.subr.bf16.mxu1 %v5184_v1 }
 0x9dc   :  { %4898 = vmatpush3.bf16.msra.mxu1 %v4897_v51 }
 0x9dd   :  { %4899 = vmatprep.subr.bf16.mxu1 %v5184_v1 }
 0xaa9   :  { %v3745_v23 = vpop.f32.mrb[36].mxu0 }
 0xaaa   :  { %v3746_v54 = vadd.f32 %v4127_v6, %v3745_v23  ;;  %v4653_v44 = vpop.f32.mrb[37].mxu0  ;;  %v3965_v6 = vld [vmem:[%s6176_s15] sm:$0xff]  ;;  %v3966_v23 = vld [vmem:[%s6176_s15 + $0x8] sm:$0xff] }
 0xaab   :  { %v4906_v44 = vpack.c.bf16 %v3882_v53, %v3881_v18 }
 0xaac   :  { %v3756_v36 = vrot.slane %v3746_v54, %v5549_v27  ;;  %v3967_v54 = vld [vmem:[%s6176_s15 + $0x10] sm:$0xff] }
 0xaae   :  { %v3757_v34 = vcombine.high %v3756_v36, %v3756_v36  ;;  %v6055_v25 = vadd.f32 %v3756_v36, %v5511_v10  ;;  %v4909_v36 = vpack.c.bf16 %v3966_v23, %v3965_v6 }
 0xab0   :  { %v3766_v56 = vmul.f32 %v3765_v55, %v6055_v25  ;;  %v6059_v3 = vadd.f32 %v3757_v34, %v5515_v13  ;;  %4910 = vmatpush3.bf16.msra.mxu0 %v4909_v36 }
 0xab1   :  { %4911 = vmatprep.subr.bf16.mxu0 %v5184_v1 }
 0xab2   :  { %v3768_v63 = vsel %vm717_vm9, %v3766_v56, 0.0  ;;  %v3767_v46 = vmul.f32 %v3765_v55, %v6059_v3  ;;  %v3968_v55 = vld [vmem:[%s6176_s15 + $0x18] sm:$0xff]  ;;  %v3969_v56 = vld [vmem:[%s6176_s15 + $0x20] sm:$0xff] }
 0xab3   :  { %3769 = vadd.xlane.f32.xlu1 %v3768_v63  ;;  %v4912_v34 = vpack.c.bf16 %v3968_v55, %v3967_v54  ;;  %v3970_v63 = vld [vmem:[%s6176_s15 + $0x28] sm:$0xff] }
 0xab4   :  { %v3771_v57 = vsel %vm717_vm9, %v3767_v46, 0.0  ;;  %v4915_v46 = vpack.c.bf16 %v3970_v63, %v3969_v56 }
 0xab5   :  { %3772 = vadd.xlane.f32.xlu0 %v3771_v57  ;;  %4913 = vmatpush3.bf16.msra.mxu0 %v4912_v34  ;;  %v3971_v57 = vld [vmem:[%s6176_s15 + $0x30] sm:$0xff] }
 0xab6   :  { %4914 = vmatprep.subr.bf16.mxu0 %v5184_v1 }
 0xab9   :  { %4916 = vmatpush3.bf16.msra.mxu0 %v4915_v46 }
 0xaba   :  { %4917 = vmatprep.subr.bf16.mxu0 %v5184_v1 }
 0xb40   :  { %v3770_v27 = vpop.xlane.xlu1 %3769 }
 0xb41   :  { %v3779_v24 = vrot.slane %v3770_v27, %v5481_v37 }
 0xb42   :  { %v3773_v29 = vpop.xlane.xlu0 %3772 }
 0xb43   :  { %v3783_v10 = vrot.slane %v3773_v29, %v5481_v37 }
 0xb45   :  { %v3784_v33 = vsel %vm432_vm6, %v3783_v10, %v3779_v24  ;;  %v3973_v24 = vld [vmem:[%s6176_s15 + $0x40] sm:$0xff]  ;;  %v3974_v10 = vld [vmem:[%s6176_s15 + $0x48] sm:$0xff] }
 0xb46   :  { %v3786_v58 = vsel %vm2221_vm2, %v3784_v33, -inf  ;;  %v4921_v33 = vpack.c.bf16 %v3974_v10, %v3973_v24 }
 0xb47   :  { %3787 = vmax.xlane.f32.xlu1 %v3786_v58  ;;  %v3975_v58 = vld [vmem:[%s6176_s15 + $0x50] sm:$0xff] }
 0xbd4   :  { %v3788_v13 = vpop.xlane.xlu1 %3787 }
 0xbd5   :  { %v3793_v47 = vrot.slane %v3788_v13, %v5362_v4  ;;  %v3797_v30 = vrot.slane %v3788_v13, %v5365_v5  ;;  %v3976_v13 = vld [vmem:[%s6176_s15 + $0x58] sm:$0xff] }
 0xbd7   :  { %v3800_v50 = vsub.f32 %v3770_v27, %v3793_v47  ;;  %v3801_v59 = vsub.f32 %v3773_v29, %v3797_v30  ;;  %v3972_v27 = vld [vmem:[%s6176_s15 + $0x38] sm:$0xff]  ;;  %v4924_v47 = vpack.c.bf16 %v3976_v13, %v3975_v58  ;;  %v3977_v30 = vld [vmem:[%s6176_s15 + $0x60] sm:$0xff] }
 0xbd8   :  { %v4918_v29 = vpack.c.bf16 %v3972_v27, %v3971_v57 }
 0xbd9   :  { %v3802_v9 = vmul.f32 1.442695, %v3800_v50  ;;  %v3804_v60 = vmul.f32 1.442695, %v3801_v59  ;;  %v3978_v50 = vld [vmem:[%s6176_s15 + $0x68] sm:$0xff] }
 0xbda   :  { %4919 = vmatpush3.bf16.msra.mxu0 %v4918_v29  ;;  %v4927_v59 = vpack.c.bf16 %v3978_v50, %v3977_v30 }
 0xbdb   :  { %5029 = vpow2.f32 %v3802_v9  ;;  %4920 = vmatprep.subr.bf16.mxu0 %v5184_v1 }
 0xbdc   :  { %5031 = vpow2.f32 %v3804_v60 }
 0xbde   :  { %4922 = vmatpush3.bf16.msra.mxu0 %v4921_v33 }
 0xbdf   :  { %4923 = vmatprep.subr.bf16.mxu0 %v5184_v1 }
 0xbe2   :  { %4925 = vmatpush3.bf16.msra.mxu0 %v4924_v47 }
 0xbe3   :  { %4926 = vmatprep.subr.bf16.mxu0 %v5184_v1 }
 0xbe5   :  { %v5030_v8 = vpop.eup %5029 }
 0xbe6   :  { %v5032_v61 = vpop.eup %5031  ;;  %3809 = vperm.xlu0 %4948, %v5030_v8   ;;  %4928 = vmatpush3.bf16.msra.mxu0 %v4927_v59 }
 0xbe7   :  { %3812 = vperm.xlu1 %4947, %v5032_v61   ;;  %4929 = vmatprep.subr.bf16.mxu0 %v5184_v1 }
 0xc65   :  { %v3810_v12 = vpop.permute.xlu0 %3809 }
 0xc66   :  { %v3813_v62 = vpop.permute.xlu1 %3812  ;;  %v3817_v14 = vrot.slane %v3810_v12, %v5481_v37 }
 0xc67   :  { %v3821_v15 = vrot.slane %v3813_v62, %v5481_v37 }
 0xc69   :  { %v3822_v11 = vsel %vm432_vm6, %v3821_v15, %v3817_v14 }
 0xc6a   :  { %v3824_v20 = vsel %vm2221_vm2, %v3822_v11, 0.0 }
 0xc6b   :  { %3825 = vadd.xlane.f32.xlu1 %v3824_v20 }
 0xcf8   :  { %v3826_v37 = vpop.xlane.xlu1 %3825 }
 0xcf9   :  { %5033 = vrcp.f32 %v3826_v37  ;;  %v4128_v37 = vld [vmem:[%s6175_s14] ss:$0 sm:$0xff] }
 0xd03   :  { %v5034_v41 = vpop.eup %5033 }
 0xd04   :  { %v3832_v28 = vrot.slane %v5034_v41, %v5362_v4  ;;  %v3836_v32 = vrot.slane %v5034_v41, %v5365_v5  ;;  %v3878_v4 = vld [vmem:[#allocation10 + $0x58] sm:$0xff]  ;;  %v3879_v5 = vld [vmem:[#allocation10 + $0x60] sm:$0xff] }
 0xd05   :  { %v4900_v35 = vpack.c.bf16 %v3878_v4, %v3877_v40  ;;  %v4903_v43 = vpack.c.bf16 %v3880_v52, %v3879_v5 }
 0xd06   :  { %v3839_v16 = vmul.f32 %v5030_v8, %v3832_v28  ;;  %v3840_v45 = vmul.f32 %v5032_v61, %v3836_v32 }
 0xd07   :  { %4901 = vmatpush3.bf16.msra.mxu1 %v4900_v35 }
 0xd08   :  { %3843 = vperm.xlu0 %4948, %v3839_v16   ;;  %4902 = vmatprep.subr.bf16.mxu1 %v5184_v1 }
 0xd0b   :  { %4904 = vmatpush3.bf16.msra.mxu1 %v4903_v43 }
 0xd0c   :  { %3848 = vperm.xlu0 %4948, %v3840_v45   ;;  %4905 = vmatprep.subr.bf16.mxu1 %v5184_v1  ;;  %v4129_v45 = vld [vmem:[%s6177_s16] ss:$0 sm:$0xff] }
 0xd0f   :  { %4907 = vmatpush3.bf16.msra.mxu1 %v4906_v44 }
 0xd87   :  { %v3844_v9 = vpop.permute.xlu0 %3843 }
 0xd88   :  { %v3851_v60 = vmul.f32 %v3844_v9, %v6055_v25 }
 0xd8a   :  { %v3853_v8 = vsel %vm717_vm9, %v3851_v60, 0.0 }
 0xd8b   :  { %v3854_v61 = vrot.slane %v3853_v8, 4  ;;  %v3849_v12 = vpop.permute.xlu0 %3848 }
 0xd8c   :  { %v3852_v62 = vmul.f32 %v3849_v12, %v6059_v3  ;;  %v3979_v3 = vld [vmem:[%s6176_s15 + $0x70] sm:$0xff]  ;;  %s5145_s15 = scalar_lea.vmem %s4067_s0, 32 }
 0xd8d   :  { %v3855_v14 = vadd.f32 %v3854_v61, %v3853_v8  ;;  %v4930_v38 = vpack.c.bf16 %v3980_v21, %v3979_v3  ;;  %p5146_p12 = scmp.ne.s32.totalorder %s4067_s0, %s5145_s15  ;;  %p5151_p0 = scmp.lt.s32.totalorder %s5145_s15, %s5145_s15 }
 0xd8e   :  { %v3860_v15 = vsel %vm717_vm9, %v3852_v62, 0.0 }
 0xd8f   :  { %v3856_v11 = vrot.slane %v3855_v14, 2  ;;  %v3861_v20 = vrot.slane %v3860_v15, 4  ;;  %4931 = vmatpush3.bf16.msra.mxu0 %v4930_v38  ;;  %p5152_p1 = por %p5151_p0, %p5150_p13 }
 0xd91   :  { %v3857_v2 = vadd.f32 %v3856_v11, %v3855_v14  ;;  %v3862_v0 = vadd.f32 %v3861_v20, %v3860_v15  ;;  %p5153_p2 = pnand %p5152_p1, %p5146_p12 }
 0xd93   :  { %v3863_v17 = vrot.slane %v3862_v0, 2  ;;  %v3858_v26 = vrot.slane %v3857_v2, 1 }
 0xd95   :  { %v3864_v31 = vadd.f32 %v3863_v17, %v3862_v0  ;;  %v3859_v19 = vadd.f32 %v3858_v26, %v3857_v2 }
 0xd97   :  { %v3865_v1 = vrot.slane %v3864_v31, 1 }
 0xd99   :  { %v3866_v22 = vadd.f32 %v3865_v1, %v3864_v31 }
 0xd9b   :  { %v3892_v25 = vsel %vm432_vm6, %v3866_v22, %v3859_v19 }
 0xd9c   :  { %4687 = vmatmul.mubr.f32.vlgmr.msra.gmra.mrb[40].mxu1 %v3892_v25 }
 0xe6f   :  { %v3960_v41 = vpop.f32.mrb[40].mxu1 }
 0xe70   :  { %v3961_v28 = vadd.f32 %v4128_v37, %v3960_v41  ;;  %v4688_v16 = vpop.f32.mrb[41].mxu1 }
 0xe72   :  { %v3964_v32 = vmul.f32 0.999995, %v3961_v28 }
 0xe74   :  { %4722 = vmatmul.mubr.f32.vlgmr.msra.gmra.mrb[38].mxu0 %v3964_v32 }
 0xf47   :  { %v4054_v39 = vpop.f32.mrb[38].mxu0 }
 0xf48   :  { %v4055_v42 = vadd.f32 %v4129_v45, %v4054_v39  ;;  %v4723_v49 = vpop.f32.mrb[39].mxu0 }
 0xf4a   :  { %4059 = vst.msk [vmem:[#allocation11] sm:$0x3] %vm4058_vm0, %v4055_v42 }
 0xf4b   :  { %5156 = shalt.err (!%p5153_p2)
}
 0xf4c   :  { %s6191_s11 = sld [smem:[#allocation18_spill]] }
 0xf52   :  { %s5157_s24 = scalar_lea.hbm %s6191_s11, 32 }
 0xf53   :  { %p5158_p3 = scmp.ne.s32.totalorder %s6191_s11, %s5157_s24  ;;  %p5161_p4 = scmp.lt.u32.totalorder %s5157_s24, %s6191_s11 }
 0xf55   :  { %p5163_p5 = pnand %p5161_p4, %p5158_p3 }
 0xf57   :  { %5166 = shalt.err (!%p5163_p5)
}
 0xf58   :  { %4069 = dma.vmem_to_hbm [thread:$0]  %s4067_s0, 32, %s6191_s11, [#allocation4]  }
 0xf59   :  { %5173 = dma.done.wait [#allocation4], 32  }
 0xf5a   :  { %5174 = vsyncadd [#allocation4], 4294967264 }
 0xf5b   :  { %4073 = vsyncpa [#allocation3], 1 }
 0xf5c   :  { %4074 = vsyncpa [#allocation6], 1 }
 0xf5d   :  { %4075 = vsyncpa [#allocation9], 1 }
 0xf5e   :  { %4076 = vsyncpa [#allocation4], 1 }

</bundles_post_ra>
